<compile_context>
chip_gen: v7x
topology: tpu7x:2x2x1
jax: 0.10.0
libtpu: 0.0.40
codegen_flags: <defaults>
</compile_context>

<pallas_src>
import jax
import jax.numpy as jnp
from jax import lax
from jax.experimental import pallas as pl
from jax.experimental.pallas import tpu as pltpu


def _lstm_attn_kernel(emb_ref, len_ref,
                      wih_ref, whh_ref, b_ref,
                      watt_ref, batt_ref, vatt_ref,
                      wcls_ref, bcls_ref, tgt_ref,
                      out_ref, attn_ref,
                      gin_scr, hs_scr):
    T, TB, E = emb_ref.shape
    H = whh_ref.shape[0]
    H4 = whh_ref.shape[1]
    A = watt_ref.shape[1]
    mm_dt = wih_ref.dtype            # matmul operand dtype (bf16); f32 accumulation

    # ---- input projection hoisted out of the recurrence:
    # one (T*TB, E) x (E, 4H) matmul instead of T tiny per-step matmuls.
    emb_all = emb_ref[...].reshape(T * TB, E)                    # bf16 (cast in wrapper)
    gates_in = (jnp.dot(emb_all, wih_ref[...],
                        preferred_element_type=jnp.float32)
                + b_ref[...])                                    # (T*TB, 4H) f32
    gin_scr[...] = gates_in.reshape(T, TB, H4)

    len_col = len_ref[...]                                       # (TB, 1) int32, hoisted

    # ---- LSTM recurrence: h/c live in vregs (fori_loop carry); only hs stored ----
    def lstm_step(t, carry):
        h_prev, c_prev = carry
        g = gin_scr[t] + jnp.dot(h_prev.astype(mm_dt), whh_ref[...],
                                 preferred_element_type=jnp.float32)   # (TB, 4H)
        # gate order permuted to (i, f, o, g) in the wrapper:
        # one sigmoid over a contiguous 3H slab, one tanh over the trailing H.
        sig = jax.nn.sigmoid(g[:, :3 * H])
        i_g = sig[:, :H]
        f_g = sig[:, H:2 * H]
        o_g = sig[:, 2 * H:]
        g_g = jnp.tanh(g[:, 3 * H:])
        c_new = f_g * c_prev + i_g * g_g
        h_new = o_g * jnp.tanh(c_new)
        # TODO(synk): torch pack_padded_sequence semantics approximated via
        # length gating: padded steps keep the previous state and are excluded
        # from the attention below.
        m_t = t < len_col                                        # (TB, 1) bool
        h_cur = jnp.where(m_t, h_new, h_prev)
        c_cur = jnp.where(m_t, c_new, c_prev)
        hs_scr[t] = h_cur.astype(hs_scr.dtype)                   # bf16 store for attention
        return (h_cur, c_cur)

    h0 = jnp.zeros((TB, H), jnp.float32)
    c0 = jnp.zeros((TB, H), jnp.float32)
    lax.fori_loop(0, T, lstm_step, (h0, c0), unroll=min(T, 8))

    # ---- additive attention, batched over all timesteps ----
    hs_all = hs_scr[...].reshape(T * TB, H)                      # bf16, feeds MXU directly
    u = jnp.tanh(jnp.dot(hs_all, watt_ref[...],
                         preferred_element_type=jnp.float32)
                 + batt_ref[...])                                # (T*TB, A) f32
    # score matvec on the VPU (broadcast-multiply + lane reduce), not an N=1 MXU matmul
    e = jnp.sum(u * vatt_ref[...], axis=-1, keepdims=True)       # (T*TB, 1) f32
    scores = e.reshape(T, TB, 1)                                 # time-major

    # masks built in-kernel from per-example lengths
    t_iota = lax.broadcasted_iota(jnp.int32, (T, TB, 1), 0)
    valid = t_iota < len_col[None]                               # (T, TB, 1) bool

    scores = jnp.where(valid, scores, -1e30)
    s_max = jnp.max(scores, axis=0, keepdims=True)               # (1, TB, 1)
    p = jnp.where(valid, jnp.exp(scores - s_max), 0.0)           # (T, TB, 1)
    denom = jnp.maximum(jnp.sum(p, axis=0, keepdims=True), 1e-30)  # NaN guard (all-pad rows)
    attn_t = p / denom                                           # (T, TB, 1)
    attn_ref[...] = attn_t          # time-major; wrapper transposes to (B, T)

    # ---- context: single broadcast multiply-reduce over resident hidden states ----
    ctx = jnp.sum(attn_t * hs_scr[...], axis=0)                  # (TB, H) f32 (bf16 promoted)

    # ---- classifier matvec (VPU) + per-example BCE-with-logits ----
    z = (jnp.sum(ctx * wcls_ref[...], axis=-1, keepdims=True)
         + bcls_ref[...])                                        # (TB, 1)
    y = tgt_ref[...]                                             # (TB, 1)
    loss = (jnp.maximum(z, 0.0) - z * y
            + jnp.log(1.0 + jnp.exp(-jnp.abs(z))))               # stable BCEWithLogits

    # fused lane-dense output block: [:, 0] = logits, [:, 1] = per-example loss
    out_ref[:, 0:1] = z
    out_ref[:, 1:2] = loss


def _to_ifog(x):
    """Permute torch gate order (i, f, g, o) -> kernel order (i, f, o, g) along axis 0."""
    i, f, g, o = jnp.split(x, 4, axis=0)
    return jnp.concatenate([i, f, o, g], axis=0)


def build_params(key, vocab, emb_dim, hidden_dim, attn_dim):
    ks = jax.random.split(key, 10)
    s = 0.1
    emb_table = jax.random.normal(ks[0], (vocab, emb_dim), jnp.float32) * s
    emb_table = emb_table.at[0].set(0.0)           # padding_idx = 0
    return {
        "emb_table": emb_table,
        "w_ih": jax.random.normal(ks[1], (4 * hidden_dim, emb_dim), jnp.float32) * s,
        "w_hh": jax.random.normal(ks[2], (4 * hidden_dim, hidden_dim), jnp.float32) * s,
        "b_ih": jax.random.normal(ks[3], (4 * hidden_dim,), jnp.float32) * s,
        "b_hh": jax.random.normal(ks[4], (4 * hidden_dim,), jnp.float32) * s,
        "w_att": jax.random.normal(ks[5], (hidden_dim, attn_dim), jnp.float32) * s,
        "b_att": jax.random.normal(ks[6], (attn_dim,), jnp.float32) * s,
        "v_att": jax.random.normal(ks[7], (attn_dim,), jnp.float32) * s,
        "w_cls": jax.random.normal(ks[8], (1, hidden_dim), jnp.float32) * s,  # torch (out,in)
        "b_cls": jax.random.normal(ks[9], (1,), jnp.float32) * s,
    }


def lstm_attention_classifier(tokens, targets, params, *,
                              batch_tile=None, matmul_dtype=jnp.bfloat16):
    B, T = tokens.shape
    E = params["emb_table"].shape[1]
    H = params["w_hh"].shape[1]
    A = params["w_att"].shape[1]

    # Batch tile: default = full batch (best on single-TC v5e/v6e: the grid is a
    # serial loop there).  On v7x keep B//TB >= 2 (even) so "parallel" splits the
    # two TensorCores, and target TB >= 128 for MXU M-rows once VMEM allows.
    TB = B if batch_tile is None else batch_tile
    assert B % TB == 0, "batch must be divisible by the batch tile"
    assert TB % 8 == 0, "batch tile must be sublane-aligned (multiple of 8)"

    # embedder (glue): lookup + lengths, same as nn.Embedding(padding_idx=0)
    emb = jnp.take(params["emb_table"], tokens, axis=0)          # (B, T, E)
    # TODO(synk): lengths assume trailing padding (pack_padded_sequence semantics).
    lengths = jnp.sum((tokens != 0).astype(jnp.int32), axis=1)   # (B,)

    mm = matmul_dtype
    emb_tme = jnp.transpose(emb, (1, 0, 2)).astype(mm)           # (T, B, E) bf16 DMA
    len_b1 = lengths.astype(jnp.int32)[:, None]                  # (B, 1)

    # gate permutation (i,f,g,o) -> (i,f,o,g); bf16 matmul operands, f32 biases.
    wih_t = _to_ifog(params["w_ih"]).T.astype(mm)                # (E, 4H)
    whh_t = _to_ifog(params["w_hh"]).T.astype(mm)                # (H, 4H)
    b_row = _to_ifog(params["b_ih"] + params["b_hh"])[None, :].astype(jnp.float32)  # (1, 4H)
    watt = params["w_att"].astype(mm)                            # (H, A)
    batt = params["b_att"][None, :].astype(jnp.float32)          # (1, A)
    vatt = params["v_att"][None, :].astype(jnp.float32)          # (1, A)  VPU matvec
    wcls = params["w_cls"].astype(jnp.float32)                   # (1, H)  VPU matvec
    bcls = params["b_cls"][None, :].astype(jnp.float32)          # (1, 1)
    tgt = targets.astype(jnp.float32)[:, None]                   # (B, 1)

    grid = (B // TB,)
    in_specs = [
        pl.BlockSpec((T, TB, E), lambda bi: (0, bi, 0)),     # embeddings (time-major, bf16)
        pl.BlockSpec((TB, 1), lambda bi: (bi, 0)),           # per-example lengths (int32)
        pl.BlockSpec((E, 4 * H), lambda bi: (0, 0)),         # W_ih^T (gate-permuted)
        pl.BlockSpec((H, 4 * H), lambda bi: (0, 0)),         # W_hh^T (gate-permuted)
        pl.BlockSpec((1, 4 * H), lambda bi: (0, 0)),         # b_ih + b_hh
        pl.BlockSpec((H, A), lambda bi: (0, 0)),             # W_att
        pl.BlockSpec((1, A), lambda bi: (0, 0)),             # b_att
        pl.BlockSpec((1, A), lambda bi: (0, 0)),             # v_att (row)
        pl.BlockSpec((1, H), lambda bi: (0, 0)),             # W_cls (row)
        pl.BlockSpec((1, 1), lambda bi: (0, 0)),             # b_cls
        pl.BlockSpec((TB, 1), lambda bi: (bi, 0)),           # targets
    ]
    out_specs = (
        pl.BlockSpec((TB, 2), lambda bi: (bi, 0)),           # fused [logits | per-ex loss]
        pl.BlockSpec((T, TB, 1), lambda bi: (0, bi, 0)),     # attention (time-major)
    )
    out_shape = (jax.ShapeDtypeStruct((B, 2), jnp.float32),
                 jax.ShapeDtypeStruct((T, B, 1), jnp.float32))

    scratch_shapes = [
        pltpu.VMEM((T, TB, 4 * H), jnp.float32),   # precomputed input gates
        pltpu.VMEM((T, TB, H), mm),                # all hidden states (bf16)
    ]

    # VMEM budget from the actual tile footprint (+headroom), capped below v7x's 64 MiB.
    bpe = jnp.dtype(mm).itemsize
    tile_bytes = (2 * T * TB * E * bpe                    # emb block, double-buffered
                  + T * TB * 4 * H * 4                    # gin scratch (f32)
                  + T * TB * H * bpe                      # hs scratch
                  + (E + H) * 4 * H * bpe + H * A * bpe   # weight blocks
                  + 2 * (T * TB + 2 * TB) * 4)            # output blocks
    vmem_limit = int(min(max(2 * tile_bytes + (2 << 20), 8 << 20), 56 << 20))

    out2, attn_tb1 = pl.pallas_call(
        _lstm_attn_kernel,
        out_shape=out_shape,
        grid=grid,
        in_specs=in_specs,
        out_specs=out_specs,
        scratch_shapes=scratch_shapes,
        compiler_params=pltpu.CompilerParams(
            dimension_semantics=("parallel",),
            vmem_limit_bytes=vmem_limit),
    )(emb_tme, len_b1, wih_t, whh_t, b_row, watt, batt, vatt, wcls, bcls, tgt)

    # glue: unpack fused output, transpose attention, mean-reduce the loss
    logits = out2[:, 0]                                   # (B,) == torch logits.view(-1)
    loss_per_ex = out2[:, 1]
    attn = attn_tb1[:, :, 0].T                            # (B, T)
    return {"output": logits,
            "loss": jnp.mean(loss_per_ex),                # BCEWithLogitsLoss (mean)
            "attentions": attn}


if __name__ == "__main__":
    key = jax.random.PRNGKey(0)
    V, E, H, A = 50, 32, 32, 32
    B, T = 32, 8

    pkey, tkey, lkey, ykey = jax.random.split(key, 4)
    params = build_params(pkey, V, E, H, A)

    tokens = jax.random.randint(tkey, (B, T), 1, V)
    lengths = jax.random.randint(lkey, (B,), 2, T + 1)
    pos = jnp.arange(T)[None, :]
    tokens = jnp.where(pos < lengths[:, None], tokens, 0)    # 0 = trailing padding token
    targets = jax.random.bernoulli(ykey, 0.5, (B,)).astype(jnp.float32)

    out = lstm_attention_classifier(tokens, targets, params, batch_tile=16)
    jax.block_until_ready(out)
    print("KERNEL_OK")
</pallas_src>

<mosaic_0001>
module attributes {stable_mosaic.version = 11 : i64} {
  func.func @_lstm_attn_kernel(%arg0: i32, %arg1: memref<8x16x32xbf16, #tpu.memory_space<vmem>>, %arg2: memref<16x1xi32, #tpu.memory_space<vmem>>, %arg3: memref<32x128xbf16, #tpu.memory_space<vmem>>, %arg4: memref<32x128xbf16, #tpu.memory_space<vmem>>, %arg5: memref<1x128xf32, #tpu.memory_space<vmem>>, %arg6: memref<32x32xbf16, #tpu.memory_space<vmem>>, %arg7: memref<1x32xf32, #tpu.memory_space<vmem>>, %arg8: memref<1x32xf32, #tpu.memory_space<vmem>>, %arg9: memref<1x32xf32, #tpu.memory_space<vmem>>, %arg10: memref<1x1xf32, #tpu.memory_space<vmem>>, %arg11: memref<16x1xf32, #tpu.memory_space<vmem>>, %arg12: memref<16x2xf32, #tpu.memory_space<vmem>>, %arg13: memref<8x16x1xf32, #tpu.memory_space<vmem>>, %arg14: memref<8x16x128xf32, #tpu.memory_space<vmem>>, %arg15: memref<8x16x32xbf16, #tpu.memory_space<vmem>>) attributes {dimension_semantics = [#tpu.dimension_semantics<parallel>], iteration_bounds = array<i64: 2>, scalar_prefetch = 0 : i64, scratch_operands = 2 : i64, tpu.core_type = #tpu.core_type<tc>, window_params = [{transform_indices = @transform_0, window_bounds = array<i64: 8, 16, 32>}, {transform_indices = @transform_1, window_bounds = array<i64: 16, 1>}, {pipeline_mode = #tpu.pipeline_mode<synchronous>, transform_indices = @transform_2, window_bounds = array<i64: 32, 128>}, {pipeline_mode = #tpu.pipeline_mode<synchronous>, transform_indices = @transform_3, window_bounds = array<i64: 32, 128>}, {pipeline_mode = #tpu.pipeline_mode<synchronous>, transform_indices = @transform_4, window_bounds = array<i64: 1, 128>}, {pipeline_mode = #tpu.pipeline_mode<synchronous>, transform_indices = @transform_5, window_bounds = array<i64: 32, 32>}, {pipeline_mode = #tpu.pipeline_mode<synchronous>, transform_indices = @transform_6, window_bounds = array<i64: 1, 32>}, {pipeline_mode = #tpu.pipeline_mode<synchronous>, transform_indices = @transform_7, window_bounds = array<i64: 1, 32>}, {pipeline_mode = #tpu.pipeline_mode<synchronous>, transform_indices = @transform_8, window_bounds = array<i64: 1, 32>}, {pipeline_mode = #tpu.pipeline_mode<synchronous>, transform_indices = @transform_9, window_bounds = array<i64: 1, 1>}, {transform_indices = @transform_10, window_bounds = array<i64: 16, 1>}, {transform_indices = @transform_11, window_bounds = array<i64: 16, 2>}, {transform_indices = @transform_12, window_bounds = array<i64: 8, 16, 1>}]} {
    %c0 = arith.constant 0 : index
    %c0_0 = arith.constant 0 : index
    %c0_1 = arith.constant 0 : index
    %0 = vector.load %arg1[%c0, %c0_0, %c0_1] : memref<8x16x32xbf16, #tpu.memory_space<vmem>>, vector<8x16x32xbf16>
    %1 = vector.shape_cast %0 : vector<8x16x32xbf16> to vector<128x32xbf16>
    %c0_2 = arith.constant 0 : index
    %c0_3 = arith.constant 0 : index
    %2 = vector.load %arg3[%c0_2, %c0_3] : memref<32x128xbf16, #tpu.memory_space<vmem>>, vector<32x128xbf16>
    %cst = arith.constant dense<0.000000e+00> : vector<128x128xf32>
    %3 = tpu.matmul %1, %2, %cst {dimension_numbers = #tpu.dot_dimension_numbers<[1], [0], [0], [1], [0, 0, 1, 1], [], []>} : vector<128x32xbf16>, vector<32x128xbf16>, vector<128x128xf32> -> vector<128x128xf32>
    %c0_4 = arith.constant 0 : index
    %c0_5 = arith.constant 0 : index
    %4 = vector.load %arg5[%c0_4, %c0_5] : memref<1x128xf32, #tpu.memory_space<vmem>>, vector<1x128xf32>
    %5 = vector.broadcast %4 : vector<1x128xf32> to vector<128x128xf32>
    %6 = arith.addf %3, %5 : vector<128x128xf32>
    %7 = vector.shape_cast %6 : vector<128x128xf32> to vector<8x16x128xf32>
    %c0_6 = arith.constant 0 : index
    %c0_7 = arith.constant 0 : index
    %c0_8 = arith.constant 0 : index
    %8 = vector.load %arg14[%c0_6, %c0_7, %c0_8] : memref<8x16x128xf32, #tpu.memory_space<vmem>>, vector<8x16x128xf32>
    tpu.vector_store %arg14[%c0_6, %c0_7, %c0_8], %7 {strides = array<i32>} : memref<8x16x128xf32, #tpu.memory_space<vmem>>, vector<8x16x128xf32>,
    %c0_9 = arith.constant 0 : index
    %c0_10 = arith.constant 0 : index
    %9 = vector.load %arg2[%c0_9, %c0_10] : memref<16x1xi32, #tpu.memory_space<vmem>>, vector<16x1xi32>
    %cst_11 = arith.constant 0.000000e+00 : f32
    %10 = vector.broadcast %cst_11 : f32 to vector<16x32xf32>
    %cst_12 = arith.constant 0.000000e+00 : f32
    %11 = vector.broadcast %cst_12 : f32 to vector<16x32xf32>
    %c0_i32 = arith.constant 0 : i32
    %12 = arith.index_cast %c0_i32 : i32 to index
    %c0_13 = arith.constant 0 : index
    %c0_14 = arith.constant 0 : index
    %13 = vector.load %arg14[%12, %c0_13, %c0_14] : memref<8x16x128xf32, #tpu.memory_space<vmem>>, vector<1x16x128xf32>
    %14 = vector.shape_cast %13 : vector<1x16x128xf32> to vector<16x128xf32>
    %15 = arith.truncf %10 : vector<16x32xf32> to vector<16x32xbf16>
    %c0_15 = arith.constant 0 : index
    %c0_16 = arith.constant 0 : index
    %16 = vector.load %arg4[%c0_15, %c0_16] : memref<32x128xbf16, #tpu.memory_space<vmem>>, vector<32x128xbf16>
    %cst_17 = arith.constant dense<0.000000e+00> : vector<16x128xf32>
    %17 = tpu.matmul %15, %16, %cst_17 {dimension_numbers = #tpu.dot_dimension_numbers<[1], [0], [0], [1], [0, 0, 1, 1], [], []>} : vector<16x32xbf16>, vector<32x128xbf16>, vector<16x128xf32> -> vector<16x128xf32>
    %18 = arith.addf %14, %17 : vector<16x128xf32>
    %19 = vector.extract_strided_slice %18 {offsets = [0, 0], sizes = [16, 96], strides = [1, 1]} : vector<16x128xf32> to vector<16x96xf32>
    %20 = arith.negf %19 : vector<16x96xf32>
    %21 = math.exp %20 : vector<16x96xf32>
    %cst_18 = arith.constant 1.000000e+00 : f32
    %22 = vector.broadcast %cst_18 : f32 to vector<16x96xf32>
    %23 = arith.addf %22, %21 : vector<16x96xf32>
    %24 = arith.divf %22, %23 : vector<16x96xf32>
    %25 = vector.extract_strided_slice %24 {offsets = [0, 0], sizes = [16, 32], strides = [1, 1]} : vector<16x96xf32> to vector<16x32xf32>
    %26 = vector.extract_strided_slice %24 {offsets = [0, 32], sizes = [16, 32], strides = [1, 1]} : vector<16x96xf32> to vector<16x32xf32>
    %27 = vector.extract_strided_slice %24 {offsets = [0, 64], sizes = [16, 32], strides = [1, 1]} : vector<16x96xf32> to vector<16x32xf32>
    %28 = vector.extract_strided_slice %18 {offsets = [0, 96], sizes = [16, 32], strides = [1, 1]} : vector<16x128xf32> to vector<16x32xf32>
    %29 = math.tanh %28 : vector<16x32xf32>
    %30 = arith.mulf %26, %11 : vector<16x32xf32>
    %31 = arith.mulf %25, %29 : vector<16x32xf32>
    %32 = arith.addf %30, %31 : vector<16x32xf32>
    %33 = math.tanh %32 : vector<16x32xf32>
    %34 = arith.mulf %27, %33 : vector<16x32xf32>
    %35 = vector.broadcast %c0_i32 : i32 to vector<16x1xi32>
    %36 = arith.cmpi slt, %35, %9 : vector<16x1xi32>
    %37 = vector.shape_cast %36 : vector<16x1xi1> to vector<16x1xi1>
    %38 = vector.broadcast %37 : vector<16x1xi1> to vector<16x32xi1>
    %39 = arith.select %38, %34, %10 : vector<16x32xi1>, vector<16x32xf32>
    %40 = vector.shape_cast %36 : vector<16x1xi1> to vector<16x1xi1>
    %41 = vector.broadcast %40 : vector<16x1xi1> to vector<16x32xi1>
    %42 = arith.select %41, %32, %11 : vector<16x32xi1>, vector<16x32xf32>
    %43 = arith.truncf %39 : vector<16x32xf32> to vector<16x32xbf16>
    %44 = arith.index_cast %c0_i32 : i32 to index
    %c0_19 = arith.constant 0 : index
    %c0_20 = arith.constant 0 : index
    %45 = vector.load %arg15[%44, %c0_19, %c0_20] : memref<8x16x32xbf16, #tpu.memory_space<vmem>>, vector<1x16x32xbf16>
    %46 = vector.shape_cast %45 : vector<1x16x32xbf16> to vector<16x32xbf16>
    %47 = vector.shape_cast %43 : vector<16x32xbf16> to vector<1x16x32xbf16>
    tpu.vector_store %arg15[%44, %c0_19, %c0_20], %47 {strides = array<i32>} : memref<8x16x32xbf16, #tpu.memory_space<vmem>>, vector<1x16x32xbf16>,
    %c1_i32 = arith.constant 1 : i32
    %48 = arith.index_cast %c1_i32 : i32 to index
    %c0_21 = arith.constant 0 : index
    %c0_22 = arith.constant 0 : index
    %49 = vector.load %arg14[%48, %c0_21, %c0_22] : memref<8x16x128xf32, #tpu.memory_space<vmem>>, vector<1x16x128xf32>
    %50 = vector.shape_cast %49 : vector<1x16x128xf32> to vector<16x128xf32>
    %51 = arith.truncf %39 : vector<16x32xf32> to vector<16x32xbf16>
    %c0_23 = arith.constant 0 : index
    %c0_24 = arith.constant 0 : index
    %52 = vector.load %arg4[%c0_23, %c0_24] : memref<32x128xbf16, #tpu.memory_space<vmem>>, vector<32x128xbf16>
    %cst_25 = arith.constant dense<0.000000e+00> : vector<16x128xf32>
    %53 = tpu.matmul %51, %52, %cst_25 {dimension_numbers = #tpu.dot_dimension_numbers<[1], [0], [0], [1], [0, 0, 1, 1], [], []>} : vector<16x32xbf16>, vector<32x128xbf16>, vector<16x128xf32> -> vector<16x128xf32>
    %54 = arith.addf %50, %53 : vector<16x128xf32>
    %55 = vector.extract_strided_slice %54 {offsets = [0, 0], sizes = [16, 96], strides = [1, 1]} : vector<16x128xf32> to vector<16x96xf32>
    %56 = arith.negf %55 : vector<16x96xf32>
    %57 = math.exp %56 : vector<16x96xf32>
    %cst_26 = arith.constant 1.000000e+00 : f32
    %58 = vector.broadcast %cst_26 : f32 to vector<16x96xf32>
    %59 = arith.addf %58, %57 : vector<16x96xf32>
    %60 = arith.divf %58, %59 : vector<16x96xf32>
    %61 = vector.extract_strided_slice %60 {offsets = [0, 0], sizes = [16, 32], strides = [1, 1]} : vector<16x96xf32> to vector<16x32xf32>
    %62 = vector.extract_strided_slice %60 {offsets = [0, 32], sizes = [16, 32], strides = [1, 1]} : vector<16x96xf32> to vector<16x32xf32>
    %63 = vector.extract_strided_slice %60 {offsets = [0, 64], sizes = [16, 32], strides = [1, 1]} : vector<16x96xf32> to vector<16x32xf32>
    %64 = vector.extract_strided_slice %54 {offsets = [0, 96], sizes = [16, 32], strides = [1, 1]} : vector<16x128xf32> to vector<16x32xf32>
    %65 = math.tanh %64 : vector<16x32xf32>
    %66 = arith.mulf %62, %42 : vector<16x32xf32>
    %67 = arith.mulf %61, %65 : vector<16x32xf32>
    %68 = arith.addf %66, %67 : vector<16x32xf32>
    %69 = math.tanh %68 : vector<16x32xf32>
    %70 = arith.mulf %63, %69 : vector<16x32xf32>
    %71 = vector.broadcast %c1_i32 : i32 to vector<16x1xi32>
    %72 = arith.cmpi slt, %71, %9 : vector<16x1xi32>
    %73 = vector.shape_cast %72 : vector<16x1xi1> to vector<16x1xi1>
    %74 = vector.broadcast %73 : vector<16x1xi1> to vector<16x32xi1>
    %75 = arith.select %74, %70, %39 : vector<16x32xi1>, vector<16x32xf32>
    %76 = vector.shape_cast %72 : vector<16x1xi1> to vector<16x1xi1>
    %77 = vector.broadcast %76 : vector<16x1xi1> to vector<16x32xi1>
    %78 = arith.select %77, %68, %42 : vector<16x32xi1>, vector<16x32xf32>
    %79 = arith.truncf %75 : vector<16x32xf32> to vector<16x32xbf16>
    %80 = arith.index_cast %c1_i32 : i32 to index
    %c0_27 = arith.constant 0 : index
    %c0_28 = arith.constant 0 : index
    %81 = vector.load %arg15[%80, %c0_27, %c0_28] : memref<8x16x32xbf16, #tpu.memory_space<vmem>>, vector<1x16x32xbf16>
    %82 = vector.shape_cast %81 : vector<1x16x32xbf16> to vector<16x32xbf16>
    %83 = vector.shape_cast %79 : vector<16x32xbf16> to vector<1x16x32xbf16>
    tpu.vector_store %arg15[%80, %c0_27, %c0_28], %83 {strides = array<i32>} : memref<8x16x32xbf16, #tpu.memory_space<vmem>>, vector<1x16x32xbf16>,
    %c2_i32 = arith.constant 2 : i32
    %84 = arith.index_cast %c2_i32 : i32 to index
    %c0_29 = arith.constant 0 : index
    %c0_30 = arith.constant 0 : index
    %85 = vector.load %arg14[%84, %c0_29, %c0_30] : memref<8x16x128xf32, #tpu.memory_space<vmem>>, vector<1x16x128xf32>
    %86 = vector.shape_cast %85 : vector<1x16x128xf32> to vector<16x128xf32>
    %87 = arith.truncf %75 : vector<16x32xf32> to vector<16x32xbf16>
    %c0_31 = arith.constant 0 : index
    %c0_32 = arith.constant 0 : index
    %88 = vector.load %arg4[%c0_31, %c0_32] : memref<32x128xbf16, #tpu.memory_space<vmem>>, vector<32x128xbf16>
    %cst_33 = arith.constant dense<0.000000e+00> : vector<16x128xf32>
    %89 = tpu.matmul %87, %88, %cst_33 {dimension_numbers = #tpu.dot_dimension_numbers<[1], [0], [0], [1], [0, 0, 1, 1], [], []>} : vector<16x32xbf16>, vector<32x128xbf16>, vector<16x128xf32> -> vector<16x128xf32>
    %90 = arith.addf %86, %89 : vector<16x128xf32>
    %91 = vector.extract_strided_slice %90 {offsets = [0, 0], sizes = [16, 96], strides = [1, 1]} : vector<16x128xf32> to vector<16x96xf32>
    %92 = arith.negf %91 : vector<16x96xf32>
    %93 = math.exp %92 : vector<16x96xf32>
    %cst_34 = arith.constant 1.000000e+00 : f32
    %94 = vector.broadcast %cst_34 : f32 to vector<16x96xf32>
    %95 = arith.addf %94, %93 : vector<16x96xf32>
    %96 = arith.divf %94, %95 : vector<16x96xf32>
    %97 = vector.extract_strided_slice %96 {offsets = [0, 0], sizes = [16, 32], strides = [1, 1]} : vector<16x96xf32> to vector<16x32xf32>
    %98 = vector.extract_strided_slice %96 {offsets = [0, 32], sizes = [16, 32], strides = [1, 1]} : vector<16x96xf32> to vector<16x32xf32>
    %99 = vector.extract_strided_slice %96 {offsets = [0, 64], sizes = [16, 32], strides = [1, 1]} : vector<16x96xf32> to vector<16x32xf32>
    %100 = vector.extract_strided_slice %90 {offsets = [0, 96], sizes = [16, 32], strides = [1, 1]} : vector<16x128xf32> to vector<16x32xf32>
    %101 = math.tanh %100 : vector<16x32xf32>
    %102 = arith.mulf %98, %78 : vector<16x32xf32>
    %103 = arith.mulf %97, %101 : vector<16x32xf32>
    %104 = arith.addf %102, %103 : vector<16x32xf32>
    %105 = math.tanh %104 : vector<16x32xf32>
    %106 = arith.mulf %99, %105 : vector<16x32xf32>
    %107 = vector.broadcast %c2_i32 : i32 to vector<16x1xi32>
    %108 = arith.cmpi slt, %107, %9 : vector<16x1xi32>
    %109 = vector.shape_cast %108 : vector<16x1xi1> to vector<16x1xi1>
    %110 = vector.broadcast %109 : vector<16x1xi1> to vector<16x32xi1>
    %111 = arith.select %110, %106, %75 : vector<16x32xi1>, vector<16x32xf32>
    %112 = vector.shape_cast %108 : vector<16x1xi1> to vector<16x1xi1>
    %113 = vector.broadcast %112 : vector<16x1xi1> to vector<16x32xi1>
    %114 = arith.select %113, %104, %78 : vector<16x32xi1>, vector<16x32xf32>
    %115 = arith.truncf %111 : vector<16x32xf32> to vector<16x32xbf16>
    %116 = arith.index_cast %c2_i32 : i32 to index
    %c0_35 = arith.constant 0 : index
    %c0_36 = arith.constant 0 : index
    %117 = vector.load %arg15[%116, %c0_35, %c0_36] : memref<8x16x32xbf16, #tpu.memory_space<vmem>>, vector<1x16x32xbf16>
    %118 = vector.shape_cast %117 : vector<1x16x32xbf16> to vector<16x32xbf16>
    %119 = vector.shape_cast %115 : vector<16x32xbf16> to vector<1x16x32xbf16>
    tpu.vector_store %arg15[%116, %c0_35, %c0_36], %119 {strides = array<i32>} : memref<8x16x32xbf16, #tpu.memory_space<vmem>>, vector<1x16x32xbf16>,
    %c3_i32 = arith.constant 3 : i32
    %120 = arith.index_cast %c3_i32 : i32 to index
    %c0_37 = arith.constant 0 : index
    %c0_38 = arith.constant 0 : index
    %121 = vector.load %arg14[%120, %c0_37, %c0_38] : memref<8x16x128xf32, #tpu.memory_space<vmem>>, vector<1x16x128xf32>
    %122 = vector.shape_cast %121 : vector<1x16x128xf32> to vector<16x128xf32>
    %123 = arith.truncf %111 : vector<16x32xf32> to vector<16x32xbf16>
    %c0_39 = arith.constant 0 : index
    %c0_40 = arith.constant 0 : index
    %124 = vector.load %arg4[%c0_39, %c0_40] : memref<32x128xbf16, #tpu.memory_space<vmem>>, vector<32x128xbf16>
    %cst_41 = arith.constant dense<0.000000e+00> : vector<16x128xf32>
    %125 = tpu.matmul %123, %124, %cst_41 {dimension_numbers = #tpu.dot_dimension_numbers<[1], [0], [0], [1], [0, 0, 1, 1], [], []>} : vector<16x32xbf16>, vector<32x128xbf16>, vector<16x128xf32> -> vector<16x128xf32>
    %126 = arith.addf %122, %125 : vector<16x128xf32>
    %127 = vector.extract_strided_slice %126 {offsets = [0, 0], sizes = [16, 96], strides = [1, 1]} : vector<16x128xf32> to vector<16x96xf32>
    %128 = arith.negf %127 : vector<16x96xf32>
    %129 = math.exp %128 : vector<16x96xf32>
    %cst_42 = arith.constant 1.000000e+00 : f32
    %130 = vector.broadcast %cst_42 : f32 to vector<16x96xf32>
    %131 = arith.addf %130, %129 : vector<16x96xf32>
    %132 = arith.divf %130, %131 : vector<16x96xf32>
    %133 = vector.extract_strided_slice %132 {offsets = [0, 0], sizes = [16, 32], strides = [1, 1]} : vector<16x96xf32> to vector<16x32xf32>
    %134 = vector.extract_strided_slice %132 {offsets = [0, 32], sizes = [16, 32], strides = [1, 1]} : vector<16x96xf32> to vector<16x32xf32>
    %135 = vector.extract_strided_slice %132 {offsets = [0, 64], sizes = [16, 32], strides = [1, 1]} : vector<16x96xf32> to vector<16x32xf32>
    %136 = vector.extract_strided_slice %126 {offsets = [0, 96], sizes = [16, 32], strides = [1, 1]} : vector<16x128xf32> to vector<16x32xf32>
    %137 = math.tanh %136 : vector<16x32xf32>
    %138 = arith.mulf %134, %114 : vector<16x32xf32>
    %139 = arith.mulf %133, %137 : vector<16x32xf32>
    %140 = arith.addf %138, %139 : vector<16x32xf32>
    %141 = math.tanh %140 : vector<16x32xf32>
    %142 = arith.mulf %135, %141 : vector<16x32xf32>
    %143 = vector.broadcast %c3_i32 : i32 to vector<16x1xi32>
    %144 = arith.cmpi slt, %143, %9 : vector<16x1xi32>
    %145 = vector.shape_cast %144 : vector<16x1xi1> to vector<16x1xi1>
    %146 = vector.broadcast %145 : vector<16x1xi1> to vector<16x32xi1>
    %147 = arith.select %146, %142, %111 : vector<16x32xi1>, vector<16x32xf32>
    %148 = vector.shape_cast %144 : vector<16x1xi1> to vector<16x1xi1>
    %149 = vector.broadcast %148 : vector<16x1xi1> to vector<16x32xi1>
    %150 = arith.select %149, %140, %114 : vector<16x32xi1>, vector<16x32xf32>
    %151 = arith.truncf %147 : vector<16x32xf32> to vector<16x32xbf16>
    %152 = arith.index_cast %c3_i32 : i32 to index
    %c0_43 = arith.constant 0 : index
    %c0_44 = arith.constant 0 : index
    %153 = vector.load %arg15[%152, %c0_43, %c0_44] : memref<8x16x32xbf16, #tpu.memory_space<vmem>>, vector<1x16x32xbf16>
    %154 = vector.shape_cast %153 : vector<1x16x32xbf16> to vector<16x32xbf16>
    %155 = vector.shape_cast %151 : vector<16x32xbf16> to vector<1x16x32xbf16>
    tpu.vector_store %arg15[%152, %c0_43, %c0_44], %155 {strides = array<i32>} : memref<8x16x32xbf16, #tpu.memory_space<vmem>>, vector<1x16x32xbf16>,
    %c4_i32 = arith.constant 4 : i32
    %156 = arith.index_cast %c4_i32 : i32 to index
    %c0_45 = arith.constant 0 : index
    %c0_46 = arith.constant 0 : index
    %157 = vector.load %arg14[%156, %c0_45, %c0_46] : memref<8x16x128xf32, #tpu.memory_space<vmem>>, vector<1x16x128xf32>
    %158 = vector.shape_cast %157 : vector<1x16x128xf32> to vector<16x128xf32>
    %159 = arith.truncf %147 : vector<16x32xf32> to vector<16x32xbf16>
    %c0_47 = arith.constant 0 : index
    %c0_48 = arith.constant 0 : index
    %160 = vector.load %arg4[%c0_47, %c0_48] : memref<32x128xbf16, #tpu.memory_space<vmem>>, vector<32x128xbf16>
    %cst_49 = arith.constant dense<0.000000e+00> : vector<16x128xf32>
    %161 = tpu.matmul %159, %160, %cst_49 {dimension_numbers = #tpu.dot_dimension_numbers<[1], [0], [0], [1], [0, 0, 1, 1], [], []>} : vector<16x32xbf16>, vector<32x128xbf16>, vector<16x128xf32> -> vector<16x128xf32>
    %162 = arith.addf %158, %161 : vector<16x128xf32>
    %163 = vector.extract_strided_slice %162 {offsets = [0, 0], sizes = [16, 96], strides = [1, 1]} : vector<16x128xf32> to vector<16x96xf32>
    %164 = arith.negf %163 : vector<16x96xf32>
    %165 = math.exp %164 : vector<16x96xf32>
    %cst_50 = arith.constant 1.000000e+00 : f32
    %166 = vector.broadcast %cst_50 : f32 to vector<16x96xf32>
    %167 = arith.addf %166, %165 : vector<16x96xf32>
    %168 = arith.divf %166, %167 : vector<16x96xf32>
    %169 = vector.extract_strided_slice %168 {offsets = [0, 0], sizes = [16, 32], strides = [1, 1]} : vector<16x96xf32> to vector<16x32xf32>
    %170 = vector.extract_strided_slice %168 {offsets = [0, 32], sizes = [16, 32], strides = [1, 1]} : vector<16x96xf32> to vector<16x32xf32>
    %171 = vector.extract_strided_slice %168 {offsets = [0, 64], sizes = [16, 32], strides = [1, 1]} : vector<16x96xf32> to vector<16x32xf32>
    %172 = vector.extract_strided_slice %162 {offsets = [0, 96], sizes = [16, 32], strides = [1, 1]} : vector<16x128xf32> to vector<16x32xf32>
    %173 = math.tanh %172 : vector<16x32xf32>
    %174 = arith.mulf %170, %150 : vector<16x32xf32>
    %175 = arith.mulf %169, %173 : vector<16x32xf32>
    %176 = arith.addf %174, %175 : vector<16x32xf32>
    %177 = math.tanh %176 : vector<16x32xf32>
    %178 = arith.mulf %171, %177 : vector<16x32xf32>
    %179 = vector.broadcast %c4_i32 : i32 to vector<16x1xi32>
    %180 = arith.cmpi slt, %179, %9 : vector<16x1xi32>
    %181 = vector.shape_cast %180 : vector<16x1xi1> to vector<16x1xi1>
    %182 = vector.broadcast %181 : vector<16x1xi1> to vector<16x32xi1>
    %183 = arith.select %182, %178, %147 : vector<16x32xi1>, vector<16x32xf32>
    %184 = vector.shape_cast %180 : vector<16x1xi1> to vector<16x1xi1>
    %185 = vector.broadcast %184 : vector<16x1xi1> to vector<16x32xi1>
    %186 = arith.select %185, %176, %150 : vector<16x32xi1>, vector<16x32xf32>
    %187 = arith.truncf %183 : vector<16x32xf32> to vector<16x32xbf16>
    %188 = arith.index_cast %c4_i32 : i32 to index
    %c0_51 = arith.constant 0 : index
    %c0_52 = arith.constant 0 : index
    %189 = vector.load %arg15[%188, %c0_51, %c0_52] : memref<8x16x32xbf16, #tpu.memory_space<vmem>>, vector<1x16x32xbf16>
    %190 = vector.shape_cast %189 : vector<1x16x32xbf16> to vector<16x32xbf16>
    %191 = vector.shape_cast %187 : vector<16x32xbf16> to vector<1x16x32xbf16>
    tpu.vector_store %arg15[%188, %c0_51, %c0_52], %191 {strides = array<i32>} : memref<8x16x32xbf16, #tpu.memory_space<vmem>>, vector<1x16x32xbf16>,
    %c5_i32 = arith.constant 5 : i32
    %192 = arith.index_cast %c5_i32 : i32 to index
    %c0_53 = arith.constant 0 : index
    %c0_54 = arith.constant 0 : index
    %193 = vector.load %arg14[%192, %c0_53, %c0_54] : memref<8x16x128xf32, #tpu.memory_space<vmem>>, vector<1x16x128xf32>
    %194 = vector.shape_cast %193 : vector<1x16x128xf32> to vector<16x128xf32>
    %195 = arith.truncf %183 : vector<16x32xf32> to vector<16x32xbf16>
    %c0_55 = arith.constant 0 : index
    %c0_56 = arith.constant 0 : index
    %196 = vector.load %arg4[%c0_55, %c0_56] : memref<32x128xbf16, #tpu.memory_space<vmem>>, vector<32x128xbf16>
    %cst_57 = arith.constant dense<0.000000e+00> : vector<16x128xf32>
    %197 = tpu.matmul %195, %196, %cst_57 {dimension_numbers = #tpu.dot_dimension_numbers<[1], [0], [0], [1], [0, 0, 1, 1], [], []>} : vector<16x32xbf16>, vector<32x128xbf16>, vector<16x128xf32> -> vector<16x128xf32>
    %198 = arith.addf %194, %197 : vector<16x128xf32>
    %199 = vector.extract_strided_slice %198 {offsets = [0, 0], sizes = [16, 96], strides = [1, 1]} : vector<16x128xf32> to vector<16x96xf32>
    %200 = arith.negf %199 : vector<16x96xf32>
    %201 = math.exp %200 : vector<16x96xf32>
    %cst_58 = arith.constant 1.000000e+00 : f32
    %202 = vector.broadcast %cst_58 : f32 to vector<16x96xf32>
    %203 = arith.addf %202, %201 : vector<16x96xf32>
    %204 = arith.divf %202, %203 : vector<16x96xf32>
    %205 = vector.extract_strided_slice %204 {offsets = [0, 0], sizes = [16, 32], strides = [1, 1]} : vector<16x96xf32> to vector<16x32xf32>
    %206 = vector.extract_strided_slice %204 {offsets = [0, 32], sizes = [16, 32], strides = [1, 1]} : vector<16x96xf32> to vector<16x32xf32>
    %207 = vector.extract_strided_slice %204 {offsets = [0, 64], sizes = [16, 32], strides = [1, 1]} : vector<16x96xf32> to vector<16x32xf32>
    %208 = vector.extract_strided_slice %198 {offsets = [0, 96], sizes = [16, 32], strides = [1, 1]} : vector<16x128xf32> to vector<16x32xf32>
    %209 = math.tanh %208 : vector<16x32xf32>
    %210 = arith.mulf %206, %186 : vector<16x32xf32>
    %211 = arith.mulf %205, %209 : vector<16x32xf32>
    %212 = arith.addf %210, %211 : vector<16x32xf32>
    %213 = math.tanh %212 : vector<16x32xf32>
    %214 = arith.mulf %207, %213 : vector<16x32xf32>
    %215 = vector.broadcast %c5_i32 : i32 to vector<16x1xi32>
    %216 = arith.cmpi slt, %215, %9 : vector<16x1xi32>
    %217 = vector.shape_cast %216 : vector<16x1xi1> to vector<16x1xi1>
    %218 = vector.broadcast %217 : vector<16x1xi1> to vector<16x32xi1>
    %219 = arith.select %218, %214, %183 : vector<16x32xi1>, vector<16x32xf32>
    %220 = vector.shape_cast %216 : vector<16x1xi1> to vector<16x1xi1>
    %221 = vector.broadcast %220 : vector<16x1xi1> to vector<16x32xi1>
    %222 = arith.select %221, %212, %186 : vector<16x32xi1>, vector<16x32xf32>
    %223 = arith.truncf %219 : vector<16x32xf32> to vector<16x32xbf16>
    %224 = arith.index_cast %c5_i32 : i32 to index
    %c0_59 = arith.constant 0 : index
    %c0_60 = arith.constant 0 : index
    %225 = vector.load %arg15[%224, %c0_59, %c0_60] : memref<8x16x32xbf16, #tpu.memory_space<vmem>>, vector<1x16x32xbf16>
    %226 = vector.shape_cast %225 : vector<1x16x32xbf16> to vector<16x32xbf16>
    %227 = vector.shape_cast %223 : vector<16x32xbf16> to vector<1x16x32xbf16>
    tpu.vector_store %arg15[%224, %c0_59, %c0_60], %227 {strides = array<i32>} : memref<8x16x32xbf16, #tpu.memory_space<vmem>>, vector<1x16x32xbf16>,
    %c6_i32 = arith.constant 6 : i32
    %228 = arith.index_cast %c6_i32 : i32 to index
    %c0_61 = arith.constant 0 : index
    %c0_62 = arith.constant 0 : index
    %229 = vector.load %arg14[%228, %c0_61, %c0_62] : memref<8x16x128xf32, #tpu.memory_space<vmem>>, vector<1x16x128xf32>
    %230 = vector.shape_cast %229 : vector<1x16x128xf32> to vector<16x128xf32>
    %231 = arith.truncf %219 : vector<16x32xf32> to vector<16x32xbf16>
    %c0_63 = arith.constant 0 : index
    %c0_64 = arith.constant 0 : index
    %232 = vector.load %arg4[%c0_63, %c0_64] : memref<32x128xbf16, #tpu.memory_space<vmem>>, vector<32x128xbf16>
    %cst_65 = arith.constant dense<0.000000e+00> : vector<16x128xf32>
    %233 = tpu.matmul %231, %232, %cst_65 {dimension_numbers = #tpu.dot_dimension_numbers<[1], [0], [0], [1], [0, 0, 1, 1], [], []>} : vector<16x32xbf16>, vector<32x128xbf16>, vector<16x128xf32> -> vector<16x128xf32>
    %234 = arith.addf %230, %233 : vector<16x128xf32>
    %235 = vector.extract_strided_slice %234 {offsets = [0, 0], sizes = [16, 96], strides = [1, 1]} : vector<16x128xf32> to vector<16x96xf32>
    %236 = arith.negf %235 : vector<16x96xf32>
    %237 = math.exp %236 : vector<16x96xf32>
    %cst_66 = arith.constant 1.000000e+00 : f32
    %238 = vector.broadcast %cst_66 : f32 to vector<16x96xf32>
    %239 = arith.addf %238, %237 : vector<16x96xf32>
    %240 = arith.divf %238, %239 : vector<16x96xf32>
    %241 = vector.extract_strided_slice %240 {offsets = [0, 0], sizes = [16, 32], strides = [1, 1]} : vector<16x96xf32> to vector<16x32xf32>
    %242 = vector.extract_strided_slice %240 {offsets = [0, 32], sizes = [16, 32], strides = [1, 1]} : vector<16x96xf32> to vector<16x32xf32>
    %243 = vector.extract_strided_slice %240 {offsets = [0, 64], sizes = [16, 32], strides = [1, 1]} : vector<16x96xf32> to vector<16x32xf32>
    %244 = vector.extract_strided_slice %234 {offsets = [0, 96], sizes = [16, 32], strides = [1, 1]} : vector<16x128xf32> to vector<16x32xf32>
    %245 = math.tanh %244 : vector<16x32xf32>
    %246 = arith.mulf %242, %222 : vector<16x32xf32>
    %247 = arith.mulf %241, %245 : vector<16x32xf32>
    %248 = arith.addf %246, %247 : vector<16x32xf32>
    %249 = math.tanh %248 : vector<16x32xf32>
    %250 = arith.mulf %243, %249 : vector<16x32xf32>
    %251 = vector.broadcast %c6_i32 : i32 to vector<16x1xi32>
    %252 = arith.cmpi slt, %251, %9 : vector<16x1xi32>
    %253 = vector.shape_cast %252 : vector<16x1xi1> to vector<16x1xi1>
    %254 = vector.broadcast %253 : vector<16x1xi1> to vector<16x32xi1>
    %255 = arith.select %254, %250, %219 : vector<16x32xi1>, vector<16x32xf32>
    %256 = vector.shape_cast %252 : vector<16x1xi1> to vector<16x1xi1>
    %257 = vector.broadcast %256 : vector<16x1xi1> to vector<16x32xi1>
    %258 = arith.select %257, %248, %222 : vector<16x32xi1>, vector<16x32xf32>
    %259 = arith.truncf %255 : vector<16x32xf32> to vector<16x32xbf16>
    %260 = arith.index_cast %c6_i32 : i32 to index
    %c0_67 = arith.constant 0 : index
    %c0_68 = arith.constant 0 : index
    %261 = vector.load %arg15[%260, %c0_67, %c0_68] : memref<8x16x32xbf16, #tpu.memory_space<vmem>>, vector<1x16x32xbf16>
    %262 = vector.shape_cast %261 : vector<1x16x32xbf16> to vector<16x32xbf16>
    %263 = vector.shape_cast %259 : vector<16x32xbf16> to vector<1x16x32xbf16>
    tpu.vector_store %arg15[%260, %c0_67, %c0_68], %263 {strides = array<i32>} : memref<8x16x32xbf16, #tpu.memory_space<vmem>>, vector<1x16x32xbf16>,
    %c7_i32 = arith.constant 7 : i32
    %264 = arith.index_cast %c7_i32 : i32 to index
    %c0_69 = arith.constant 0 : index
    %c0_70 = arith.constant 0 : index
    %265 = vector.load %arg14[%264, %c0_69, %c0_70] : memref<8x16x128xf32, #tpu.memory_space<vmem>>, vector<1x16x128xf32>
    %266 = vector.shape_cast %265 : vector<1x16x128xf32> to vector<16x128xf32>
    %267 = arith.truncf %255 : vector<16x32xf32> to vector<16x32xbf16>
    %c0_71 = arith.constant 0 : index
    %c0_72 = arith.constant 0 : index
    %268 = vector.load %arg4[%c0_71, %c0_72] : memref<32x128xbf16, #tpu.memory_space<vmem>>, vector<32x128xbf16>
    %cst_73 = arith.constant dense<0.000000e+00> : vector<16x128xf32>
    %269 = tpu.matmul %267, %268, %cst_73 {dimension_numbers = #tpu.dot_dimension_numbers<[1], [0], [0], [1], [0, 0, 1, 1], [], []>} : vector<16x32xbf16>, vector<32x128xbf16>, vector<16x128xf32> -> vector<16x128xf32>
    %270 = arith.addf %266, %269 : vector<16x128xf32>
    %271 = vector.extract_strided_slice %270 {offsets = [0, 0], sizes = [16, 96], strides = [1, 1]} : vector<16x128xf32> to vector<16x96xf32>
    %272 = arith.negf %271 : vector<16x96xf32>
    %273 = math.exp %272 : vector<16x96xf32>
    %cst_74 = arith.constant 1.000000e+00 : f32
    %274 = vector.broadcast %cst_74 : f32 to vector<16x96xf32>
    %275 = arith.addf %274, %273 : vector<16x96xf32>
    %276 = arith.divf %274, %275 : vector<16x96xf32>
    %277 = vector.extract_strided_slice %276 {offsets = [0, 0], sizes = [16, 32], strides = [1, 1]} : vector<16x96xf32> to vector<16x32xf32>
    %278 = vector.extract_strided_slice %276 {offsets = [0, 32], sizes = [16, 32], strides = [1, 1]} : vector<16x96xf32> to vector<16x32xf32>
    %279 = vector.extract_strided_slice %276 {offsets = [0, 64], sizes = [16, 32], strides = [1, 1]} : vector<16x96xf32> to vector<16x32xf32>
    %280 = vector.extract_strided_slice %270 {offsets = [0, 96], sizes = [16, 32], strides = [1, 1]} : vector<16x128xf32> to vector<16x32xf32>
    %281 = math.tanh %280 : vector<16x32xf32>
    %282 = arith.mulf %278, %258 : vector<16x32xf32>
    %283 = arith.mulf %277, %281 : vector<16x32xf32>
    %284 = arith.addf %282, %283 : vector<16x32xf32>
    %285 = math.tanh %284 : vector<16x32xf32>
    %286 = arith.mulf %279, %285 : vector<16x32xf32>
    %287 = vector.broadcast %c7_i32 : i32 to vector<16x1xi32>
    %288 = arith.cmpi slt, %287, %9 : vector<16x1xi32>
    %289 = vector.shape_cast %288 : vector<16x1xi1> to vector<16x1xi1>
    %290 = vector.broadcast %289 : vector<16x1xi1> to vector<16x32xi1>
    %291 = arith.select %290, %286, %255 : vector<16x32xi1>, vector<16x32xf32>
    %292 = vector.shape_cast %288 : vector<16x1xi1> to vector<16x1xi1>
    %293 = vector.broadcast %292 : vector<16x1xi1> to vector<16x32xi1>
    %294 = arith.select %293, %284, %258 : vector<16x32xi1>, vector<16x32xf32>
    %295 = arith.truncf %291 : vector<16x32xf32> to vector<16x32xbf16>
    %296 = arith.index_cast %c7_i32 : i32 to index
    %c0_75 = arith.constant 0 : index
    %c0_76 = arith.constant 0 : index
    %297 = vector.load %arg15[%296, %c0_75, %c0_76] : memref<8x16x32xbf16, #tpu.memory_space<vmem>>, vector<1x16x32xbf16>
    %298 = vector.shape_cast %297 : vector<1x16x32xbf16> to vector<16x32xbf16>
    %299 = vector.shape_cast %295 : vector<16x32xbf16> to vector<1x16x32xbf16>
    tpu.vector_store %arg15[%296, %c0_75, %c0_76], %299 {strides = array<i32>} : memref<8x16x32xbf16, #tpu.memory_space<vmem>>, vector<1x16x32xbf16>,
    %c8_i32 = arith.constant 8 : i32
    %c0_77 = arith.constant 0 : index
    %c0_78 = arith.constant 0 : index
    %c0_79 = arith.constant 0 : index
    %300 = vector.load %arg15[%c0_77, %c0_78, %c0_79] : memref<8x16x32xbf16, #tpu.memory_space<vmem>>, vector<8x16x32xbf16>
    %301 = vector.shape_cast %300 : vector<8x16x32xbf16> to vector<128x32xbf16>
    %c0_80 = arith.constant 0 : index
    %c0_81 = arith.constant 0 : index
    %302 = vector.load %arg6[%c0_80, %c0_81] : memref<32x32xbf16, #tpu.memory_space<vmem>>, vector<32x32xbf16>
    %cst_82 = arith.constant dense<0.000000e+00> : vector<128x32xf32>
    %303 = tpu.matmul %301, %302, %cst_82 {dimension_numbers = #tpu.dot_dimension_numbers<[1], [0], [0], [1], [0, 0, 1, 1], [], []>} : vector<128x32xbf16>, vector<32x32xbf16>, vector<128x32xf32> -> vector<128x32xf32>
    %c0_83 = arith.constant 0 : index
    %c0_84 = arith.constant 0 : index
    %304 = vector.load %arg7[%c0_83, %c0_84] : memref<1x32xf32, #tpu.memory_space<vmem>>, vector<1x32xf32>
    %305 = vector.broadcast %304 : vector<1x32xf32> to vector<128x32xf32>
    %306 = arith.addf %303, %305 : vector<128x32xf32>
    %307 = math.tanh %306 : vector<128x32xf32>
    %c0_85 = arith.constant 0 : index
    %c0_86 = arith.constant 0 : index
    %308 = vector.load %arg8[%c0_85, %c0_86] : memref<1x32xf32, #tpu.memory_space<vmem>>, vector<1x32xf32>
    %309 = vector.broadcast %308 : vector<1x32xf32> to vector<128x32xf32>
    %310 = arith.mulf %307, %309 : vector<128x32xf32>
    %cst_87 = arith.constant dense<0.000000e+00> : vector<128xf32>
    %311 = vector.multi_reduction <add>, %310, %cst_87 [1] : vector<128x32xf32> to vector<128xf32>
    %312 = vector.shape_cast %311 : vector<128xf32> to vector<128x1xf32>
    %313 = vector.shape_cast %312 : vector<128x1xf32> to vector<8x16x1xf32>
    %314 = tpu.iota {dimensions = array<i32: 0>} : vector<8x16x1xi32>
    %315 = vector.shape_cast %9 : vector<16x1xi32> to vector<1x16x1xi32>
    %316 = vector.broadcast %315 : vector<1x16x1xi32> to vector<8x16x1xi32>
    %317 = arith.cmpi slt, %314, %316 : vector<8x16x1xi32>
    %cst_88 = arith.constant -1.000000e+30 : f32
    %318 = vector.broadcast %cst_88 : f32 to vector<8x16x1xf32>
    %319 = arith.select %317, %313, %318 : vector<8x16x1xi1>, vector<8x16x1xf32>
    %cst_89 = arith.constant dense<0xFF800000> : vector<16x1xf32>
    %320 = vector.multi_reduction <maximumf>, %319, %cst_89 [0] : vector<8x16x1xf32> to vector<16x1xf32>
    %321 = vector.shape_cast %320 : vector<16x1xf32> to vector<1x16x1xf32>
    %322 = vector.broadcast %321 : vector<1x16x1xf32> to vector<8x16x1xf32>
    %323 = arith.subf %319, %322 : vector<8x16x1xf32>
    %324 = math.exp %323 : vector<8x16x1xf32>
    %cst_90 = arith.constant 0.000000e+00 : f32
    %325 = vector.broadcast %cst_90 : f32 to vector<8x16x1xf32>
    %326 = arith.select %317, %324, %325 : vector<8x16x1xi1>, vector<8x16x1xf32>
    %cst_91 = arith.constant dense<0.000000e+00> : vector<16x1xf32>
    %327 = vector.multi_reduction <add>, %326, %cst_91 [0] : vector<8x16x1xf32> to vector<16x1xf32>
    %328 = vector.shape_cast %327 : vector<16x1xf32> to vector<1x16x1xf32>
    %cst_92 = arith.constant 1.000000e-30 : f32
    %329 = vector.broadcast %cst_92 : f32 to vector<1x16x1xf32>
    %330 = arith.maximumf %328, %329 : vector<1x16x1xf32>
    %331 = vector.broadcast %330 : vector<1x16x1xf32> to vector<8x16x1xf32>
    %332 = arith.divf %326, %331 : vector<8x16x1xf32>
    %c0_93 = arith.constant 0 : index
    %c0_94 = arith.constant 0 : index
    %c0_95 = arith.constant 0 : index
    %333 = vector.load %arg13[%c0_93, %c0_94, %c0_95] : memref<8x16x1xf32, #tpu.memory_space<vmem>>, vector<8x16x1xf32>
    tpu.vector_store %arg13[%c0_93, %c0_94, %c0_95], %332 {strides = array<i32>} : memref<8x16x1xf32, #tpu.memory_space<vmem>>, vector<8x16x1xf32>,
    %c0_96 = arith.constant 0 : index
    %c0_97 = arith.constant 0 : index
    %c0_98 = arith.constant 0 : index
    %334 = vector.load %arg15[%c0_96, %c0_97, %c0_98] : memref<8x16x32xbf16, #tpu.memory_space<vmem>>, vector<8x16x32xbf16>
    %335 = arith.extf %334 : vector<8x16x32xbf16> to vector<8x16x32xf32>
    %336 = vector.broadcast %332 : vector<8x16x1xf32> to vector<8x16x32xf32>
    %337 = arith.mulf %336, %335 : vector<8x16x32xf32>
    %cst_99 = arith.constant dense<0.000000e+00> : vector<16x32xf32>
    %338 = vector.multi_reduction <add>, %337, %cst_99 [0] : vector<8x16x32xf32> to vector<16x32xf32>
    %c0_100 = arith.constant 0 : index
    %c0_101 = arith.constant 0 : index
    %339 = vector.load %arg9[%c0_100, %c0_101] : memref<1x32xf32, #tpu.memory_space<vmem>>, vector<1x32xf32>
    %340 = vector.broadcast %339 : vector<1x32xf32> to vector<16x32xf32>
    %341 = arith.mulf %338, %340 : vector<16x32xf32>
    %cst_102 = arith.constant dense<0.000000e+00> : vector<16xf32>
    %342 = vector.multi_reduction <add>, %341, %cst_102 [1] : vector<16x32xf32> to vector<16xf32>
    %343 = vector.shape_cast %342 : vector<16xf32> to vector<16x1xf32>
    %c0_103 = arith.constant 0 : index
    %c0_104 = arith.constant 0 : index
    %344 = vector.load %arg10[%c0_103, %c0_104] : memref<1x1xf32, #tpu.memory_space<vmem>>, vector<1x1xf32>
    %345 = vector.broadcast %344 : vector<1x1xf32> to vector<16x1xf32>
    %346 = arith.addf %343, %345 : vector<16x1xf32>
    %c0_105 = arith.constant 0 : index
    %c0_106 = arith.constant 0 : index
    %347 = vector.load %arg11[%c0_105, %c0_106] : memref<16x1xf32, #tpu.memory_space<vmem>>, vector<16x1xf32>
    %cst_107 = arith.constant 0.000000e+00 : f32
    %348 = vector.broadcast %cst_107 : f32 to vector<16x1xf32>
    %349 = arith.maximumf %346, %348 : vector<16x1xf32>
    %350 = arith.mulf %346, %347 : vector<16x1xf32>
    %351 = arith.subf %349, %350 : vector<16x1xf32>
    %352 = math.absf %346 : vector<16x1xf32>
    %cst_108 = arith.constant 0.000000e+00 : f32
    %353 = vector.broadcast %cst_108 : f32 to vector<16x1xf32>
    %354 = arith.subf %353, %352 : vector<16x1xf32>
    %355 = math.exp %354 : vector<16x1xf32>
    %cst_109 = arith.constant 1.000000e+00 : f32
    %356 = vector.broadcast %cst_109 : f32 to vector<16x1xf32>
    %357 = arith.addf %356, %355 : vector<16x1xf32>
    %358 = math.log %357 : vector<16x1xf32>
    %359 = arith.addf %351, %358 : vector<16x1xf32>
    %c0_110 = arith.constant 0 : index
    %c0_111 = arith.constant 0 : index
    %360 = vector.load %arg12[%c0_110, %c0_111] : memref<16x2xf32, #tpu.memory_space<vmem>>, vector<16x1xf32>
    tpu.vector_store %arg12[%c0_110, %c0_111], %346 {strides = array<i32>} : memref<16x2xf32, #tpu.memory_space<vmem>>, vector<16x1xf32>,
    %c0_112 = arith.constant 0 : index
    %c1 = arith.constant 1 : index
    %361 = vector.load %arg12[%c0_112, %c1] : memref<16x2xf32, #tpu.memory_space<vmem>>, vector<16x1xf32>
    tpu.vector_store %arg12[%c0_112, %c1], %359 {strides = array<i32>} : memref<16x2xf32, #tpu.memory_space<vmem>>, vector<16x1xf32>,
    return
  }
  func.func @transform_0(%arg0: i32) -> (i32, i32, i32) {
    %c0_i32 = arith.constant 0 : i32
    %c0_i32_0 = arith.constant 0 : i32
    %c0_i32_1 = arith.constant 0 : i32
    return %c0_i32, %arg0, %c0_i32_0 : i32, i32, i32
  }
  func.func @transform_1(%arg0: i32) -> (i32, i32) {
    %c0_i32 = arith.constant 0 : i32
    %c0_i32_0 = arith.constant 0 : i32
    return %arg0, %c0_i32 : i32, i32
  }
  func.func @transform_2(%arg0: i32) -> (i32, i32) {
    %c0_i32 = arith.constant 0 : i32
    %c0_i32_0 = arith.constant 0 : i32
    %c0_i32_1 = arith.constant 0 : i32
    return %c0_i32, %c0_i32_0 : i32, i32
  }
  func.func @transform_3(%arg0: i32) -> (i32, i32) {
    %c0_i32 = arith.constant 0 : i32
    %c0_i32_0 = arith.constant 0 : i32
    %c0_i32_1 = arith.constant 0 : i32
    return %c0_i32, %c0_i32_0 : i32, i32
  }
  func.func @transform_4(%arg0: i32) -> (i32, i32) {
    %c0_i32 = arith.constant 0 : i32
    %c0_i32_0 = arith.constant 0 : i32
    %c0_i32_1 = arith.constant 0 : i32
    return %c0_i32, %c0_i32_0 : i32, i32
  }
  func.func @transform_5(%arg0: i32) -> (i32, i32) {
    %c0_i32 = arith.constant 0 : i32
    %c0_i32_0 = arith.constant 0 : i32
    %c0_i32_1 = arith.constant 0 : i32
    return %c0_i32, %c0_i32_0 : i32, i32
  }
  func.func @transform_6(%arg0: i32) -> (i32, i32) {
    %c0_i32 = arith.constant 0 : i32
    %c0_i32_0 = arith.constant 0 : i32
    %c0_i32_1 = arith.constant 0 : i32
    return %c0_i32, %c0_i32_0 : i32, i32
  }
  func.func @transform_7(%arg0: i32) -> (i32, i32) {
    %c0_i32 = arith.constant 0 : i32
    %c0_i32_0 = arith.constant 0 : i32
    %c0_i32_1 = arith.constant 0 : i32
    return %c0_i32, %c0_i32_0 : i32, i32
  }
  func.func @transform_8(%arg0: i32) -> (i32, i32) {
    %c0_i32 = arith.constant 0 : i32
    %c0_i32_0 = arith.constant 0 : i32
    %c0_i32_1 = arith.constant 0 : i32
    return %c0_i32, %c0_i32_0 : i32, i32
  }
  func.func @transform_9(%arg0: i32) -> (i32, i32) {
    %c0_i32 = arith.constant 0 : i32
    %c0_i32_0 = arith.constant 0 : i32
    %c0_i32_1 = arith.constant 0 : i32
    return %c0_i32, %c0_i32_0 : i32, i32
  }
  func.func @transform_10(%arg0: i32) -> (i32, i32) {
    %c0_i32 = arith.constant 0 : i32
    %c0_i32_0 = arith.constant 0 : i32
    return %arg0, %c0_i32 : i32, i32
  }
  func.func @transform_11(%arg0: i32) -> (i32, i32) {
    %c0_i32 = arith.constant 0 : i32
    %c0_i32_0 = arith.constant 0 : i32
    return %arg0, %c0_i32 : i32, i32
  }
  func.func @transform_12(%arg0: i32) -> (i32, i32, i32) {
    %c0_i32 = arith.constant 0 : i32
    %c0_i32_0 = arith.constant 0 : i32
    %c0_i32_1 = arith.constant 0 : i32
    return %c0_i32, %arg0, %c0_i32_0 : i32, i32, i32
  }
}

</mosaic_0001>

<bundles_post_ra>
// kernel: tpu_custom_call.1
= control target key start
LH: loop header
LB: loop body
LE: loop exit
PB: predicated region body
PF: predicated region fallthrough
CT: control target
= control target key end

     0   :  { %s4323_s0 = inlined_call_operand.hbm [shape: bf16[8,32,32], index: 0, kind: input, shape index: {}]   ;;  %s4324_s1 = inlined_call_operand.vmem [shape: s32[32,1], index: 1, kind: input, shape index: {}]   ;;  %s4325_s2 = inlined_call_operand.vmem [shape: bf16[32,128], index: 2, kind: input, shape index: {}]   ;;  %s4326_s3 = inlined_call_operand.vmem [shape: bf16[32,128], index: 3, kind: input, shape index: {}]   ;;  %s4327_s4 = inlined_call_operand.vmem [shape: f32[1,128], index: 4, kind: input, shape index: {}]   ;;  %s4328_s5 = inlined_call_operand.vmem [shape: bf16[32,32], index: 5, kind: input, shape index: {}]   ;;  %s4329_s6 = inlined_call_operand.vmem [shape: f32[1,32], index: 6, kind: input, shape index: {}]   ;;  %s4330_s7 = inlined_call_operand.vmem [shape: f32[1,32], index: 7, kind: input, shape index: {}]   ;;  %s4331_s8 = inlined_call_operand.vmem [shape: f32[1,32], index: 8, kind: input, shape index: {}]   ;;  %s4332_s9 = inlined_call_operand.<no memory space> [shape: f32[1,1], index: 9, kind: input, shape index: {}]   ;;  %s4333_s10 = inlined_call_operand.vmem [shape: f32[32,1], index: 10, kind: input, shape index: {}]   ;;  %s4334_s11 = inlined_call_operand.vmem [shape: f32[32,2], index: 11, kind: output, shape index: {0}]   ;;  %s4335_s12 = inlined_call_operand.vmem [shape: f32[8,32,1], index: 12, kind: output, shape index: {1}]  }
   0x1   :  { %4343 = sst [smem:[#allocation15_spill]] %s4335_s12  ;;  %v18_v0 = vstv %s4332_s9 }
   0x2   :  { %19 = vst [vmem:[#allocation4] sm:$0x1] %v18_v0 }
   0x3   :  { %20 = vsyncpa [#allocation6], 0 }
   0x4   :  { %22 = vsyncpa [#allocation6 + $0x1], 0  ;;  %s3326_s23 = smov 0   ;;  %s3328_s24 = smov 0  }
   0x5   :  { %s3330_s25 = smov 0   ;;  %s3332_s26 = smov 0  }
   0x6 LB: > { %4344 = sst [smem:[#allocation12_spill]] %s3240_s25  ;;  %s3345_s9 = sadd.s32 4294967295, %s3244_s26   ;;  %s3244_s26 = sphi %s3332_s26, %s4375_s26   ;;  %s3240_s25 = sphi %s3330_s25, %s4377_s25   ;;  %s3236_s24 = sphi %s3328_s24, %s4379_s24   ;;  %s3232_s23 = sphi %s3326_s23, %s4378_s23  }
   0x7   : > { %s3348_s27 = sadd.s32 1, %s3244_s26   ;;  %s35_s29 = sadd.s32 1, %s3240_s25 }
   0x8   : > { %4345 = sst [smem:[#allocation13_spill]] %s3348_s27  ;;  %s32_s28 = ssub.s32 %s3244_s26, %s3348_s27 }
   0x9   : > { %p33_p0 = scmp.eq.s32.totalorder %s32_s28, 0  ;;  %p42_p1 = scmp.ne.s32.totalorder %s3240_s25, %s3236_s24 }
   0xa   : > { %p43_p2 = scmp.eq.s32.totalorder %s3244_s26, 0  ;;  %p48_p3 = scmp.ne.s32.totalorder %s3236_s24, %s3232_s23 }
   0xb   : > { %s3358_s30 = scalar_select %p33_p0, %s3240_s25, %s35_s29  }
   0xc   : > { %p3360_p4 = por %p43_p2, %p42_p1  ;;  %p49_p5 = scmp.eq.s32.totalorder %s3345_s9, 0 }
   0xd   : > { %4346 = sst [smem:[#allocation14_spill]] %s3358_s30  ;;  %p318_p6 = scmp.eq.s32.totalorder %s3345_s9, 1 }
   0xe   : > { %p3366_p7 = por %p49_p5, %p48_p3  ;;  %p2670_p9 = scmp.ge.s32.totalorder %s3244_s26, 2 }
   0xf   : > { %p3370_p8 = por %p318_p6, %p42_p1 }
  0x10   : > { %364 = sbr.rel (%p2670_p9) target bundleno = 36 (0x24), region = 48 }
  0x17   : > { %s368_s16 = sand.u32 1, %s3240_s25   ;;  %s2762_s17 = sshll.u32 %s3244_s26, 7 }
  0x18   : > { %s2671_s18 = sshll.u32 %s368_s16, 6  ;;  %s378_s21 = scalar_lea.hbm %s4323_s0, %s2762_s17 }
  0x19   : > { %s2916_s22 = scalar_select %p3360_p4, [#allocation0], [#allocation10] }
  0x1a   : > { %s372_s23 = scalar_lea.vmem [#allocation5], %s2671_s18  ;;  %s3246_s30 = smov 256  }
  0x1b   : > { %s391_s28 = sshll.u32 %s372_s23, 4  ;;  %s383_s29 = sld [smem:[%s2916_s22]]   ;;  %s392_s28 = int_to_ptr.vmem [resolvable:$true] %s391_s28 }
  0x1c   : > { %2917 = sst [smem:[#allocation9]] (%p3360_p4), %s3246_s30  ;;  %s3247_s25 = smov 128  }
  0x1d   : > { %2918 = sst [smem:[#allocation9 + $0x1]] (%p3360_p4), %s3247_s25  ;;  %s3248_s27 = smov 2  }
  0x1e   : > { %2919 = sst [smem:[#allocation9 + $0x2]] (%p3360_p4), %s3248_s27  ;;  %s3249_s12 = smov 64  }
  0x1f   : > { %2920 = sst [smem:[#allocation9 + $0x3]] (%p3360_p4), %s3249_s12  ;;  %s3250_s18 = smov 4  }
  0x20   : > { %2921 = sst [smem:[#allocation9 + $0x4]] (%p3360_p4), %s3249_s12  ;;  %s369_s20 = scalar_lea.sflag [#allocation6], %s368_s16 }
  0x21   : > { %s2674_s17 = sshll.u32 %s383_s29, 26  ;;  %2922 = sst [smem:[#allocation9 + $0x5]] (%p3360_p4), %s3250_s18 }
  0x22   : > { %s2675_s19 = sadd.s32 134217728, %s2674_s17  ;;  %s3251_s22 = smov [#allocation8]  }
  0x23   : > { %2923 = dma.general (%p3360_p4), %s378_s21, 1024, %s392_s28, %s369_s20, %s3251_s22, [#allocation9], %s2675_s19, 0  }
  0x24 PF: > { %p2676_p10 = scmp.ge.s32.totalorder %s3244_s26, 1  ;;  %p430_p11 = scmp.lt.s32.totalorder %s3244_s26, 3 }
  0x26   : > { %p431_p12 = pnand %p2676_p10, %p430_p11 }
  0x27   : > { %s3399_s25 = sand.u32 (!%p431_p12), 1, %s3236_s24  }
  0x28   : > { %434 = sbr.rel (%p431_p12) target bundleno = 6626 (0x19e2), region = 64  ;;  %s2677_s12 = sshll.u32 (!%p431_p12), %s3399_s25, 6 }
  0x29   : > { %s437_s27 = scalar_lea.sflag (!%p431_p12), [#allocation6], %s3399_s25  ;;  %s3403_s30 = scalar_lea.vmem (!%p431_p12), [#allocation5], %s2677_s12 }
  0x2f   : > { %3227 = dma.done.wait (%p3366_p7), %s437_s27, 1024  }
  0x30   : > { %3229 = vsyncadd (%p3366_p7), %s437_s27, 4294966272  ;;  %v3252_v1 = vmov 0   ;;  %v2971_v2 = vld [vmem:[%s4325_s2] sm:$0xff]   ;;  %v2972_v3 = vld [vmem:[%s4325_s2 + $0x8] sm:$0xff]   ;;  %vm4342_vm0 = vcmask 261120   ;;  %v3253_v8 = vmov 0.0  }
  0x31   : > { %2969 = vset.pattern.permute.xlu0 %v3252_v1  ;;  %2970 = vset.pattern.permute.xlu1 %v3252_v1  ;;  %v2973_v4 = vld [vmem:[%s3403_s30 + $0x20] sm:$0xff]   ;;  %v2974_v5 = vld [vmem:[%s3403_s30 + $0x28] sm:$0xff]   ;;  %v2976_v7 = vld [vmem:[%s3403_s30 + $0x30] sm:$0xff]   ;;  %vm3254_vm1 = vmmov 0   ;;  %s2679_s19 = sshll.u32 %s3345_s9, 1  ;;  %s3255_s26 = smov 32  }
  0x32   : > { %2912 = vmatprep.subr.bf16.mxu1 %v2971_v2  ;;  %2808 = vmatprep.subr.bf16.mxu0 %v2971_v2  ;;  %v2975_v6 = vld [vmem:[%s4326_s3] sm:$0xff]   ;;  %v2980_v10 = vld [vmem:[%s3403_s30 + $0x8] sm:$0xff]   ;;  %p497_p13 = scmp.lt.s32.totalorder %s2679_s19, 3  ;;  %s3256_s23 = smov 64  }
  0x33   : > { %2914 = vmatpush3.bf16.msra.mxu1 %v2971_v2  ;;  %2809 = vmatpush3.bf16.msra.mxu0 %v2971_v2  ;;  %v2979_v9 = vld [vmem:[%s3403_s30] sm:$0xff]   ;;  %v2977_v12 = vld [vmem:[%s3403_s30 + $0x38] sm:$0xff]   ;;  %s4374_s22 = sld [smem:[#allocation15_spill]] (%p3370_p8) }
  0x34   : > { %2913 = vmatprep.subr.bf16.mxu1 %v2972_v3  ;;  %2820 = vmatprep.mubr.msk.bf16.mxu1 %vm4342_vm0, %v2973_v4  ;;  %v2978_v11 = vld [vmem:[%s4326_s3 + $0x8] sm:$0xff]   ;;  %v3467_v25 = vld [vmem:[%s4327_s4] ss:$0 sm:$0xff]  ;;  %s4381_s19 = smov (!%p497_p13, %s2679_s19), 3 }
  0x35   : > { %2810 = vmatprep.subr.bf16.mxu0 %v2972_v3  ;;  %2812 = vmatprep.mubr.msk.bf16.mxu0 %vm4342_vm0, %v2979_v9  ;;  %s3472_s20 = sshll.u32 %s4381_s19, 3  ;;  %v2981_v58 = vld [vmem:[%s4326_s3] sm:$0xff]   ;;  %v2982_v59 = vld [vmem:[%s4326_s3 + $0x8] sm:$0xff]  }
  0x36   : > { %s3478_s27 = scalar_lea.vmem %s4324_s1, %s3472_s20  ;;  %s4276_s28 = scalar_lea.vmem %s4334_s11, %s3472_s20 }
  0x37   : > { %2915 = vmatpush3.bf16.msra.mxu1 %v2972_v3  ;;  %2811 = vmatpush3.bf16.msra.mxu0 %v2972_v3  ;;  %v3481_v35 = vld [vmem:[%s3478_s27] sm:$0xff]  ;;  %v3490_v47 = vld [vmem:[%s3478_s27 + $0x8] sm:$0xff]  ;;  %s506_s18 = scalar_lea.vmem %s4333_s10, %s3472_s20  ;;  %s2763_s20 = sshll.u32 (%p3370_p8), %s3345_s9, 4 }
  0x38   : > { %2828 = vmatprep.subr.bf16.mxu1 %v3253_v8  ;;  %2860 = vmatprep.subr.bf16.mxu0 %v3253_v8  ;;  %vm847_vm2 = vcmp.gt.s32.totalorder %v3481_v35, 0  ;;  %vm848_vm3 = vcmp.gt.s32.totalorder %v3490_v47, 0  ;;  %vm982_vm6 = vcmp.gt.s32.totalorder %v3481_v35, 1  ;;  %vm983_vm7 = vcmp.gt.s32.totalorder %v3490_v47, 1 }
  0x39   : > { %v849_v37 = vsel %vm847_vm2, 1, %v3252_v1  ;;  %v850_v51 = vsel %vm848_vm3, 1, %v3252_v1  ;;  %vm1118_vm10 = vcmp.gt.s32.totalorder %v3481_v35, 2  ;;  %vm1119_vm11 = vcmp.gt.s32.totalorder %v3490_v47, 2 }
  0x3a   : > { %2821 = vmatmul.mubr.msk.bf16.vlgmr.msra.gmra.mrb[0].mxu1 %vm4342_vm0, %v2974_v5  ;;  %2813 = vmatmul.mubr.msk.bf16.vlgmr.msra.gmra.mrb[0].mxu0 %vm4342_vm0, %v2980_v10  ;;  %vm1254_vm14 = vcmp.gt.s32.totalorder %v3481_v35, 3  ;;  %vm1255_vm15 = vcmp.gt.s32.totalorder %v3490_v47, 3 }
  0x3b   : > { %2829 = vmatpush3.bf16.msra.mxu1 %v2975_v6  ;;  %2824 = vmatprep.mubr.msk.bf16.mxu1 %vm4342_vm0, %v2976_v7 }
  0x3c   : > { %2830 = vmatprep.subr.bf16.mxu1 %v3253_v8 }
  0x3f   : > { %2831 = vmatpush3.bf16.msra.mxu1 %v2978_v11 }
  0x40   : > { %2836 = vmatprep.subr.bf16.mxu1 %v3253_v8 }
  0x42   : > { %2825 = vmatmul.mubr.msk.bf16.gmra.mrb[4].mxu1 %vm4342_vm0, %v2977_v12 }
  0x43   : > { %2832 = vmatprep.mubr.msk.bf16.mxu1 %vm3254_vm1, %v3253_v8 }
  0x4a   : > { %2833 = vmatmul.mubr.bf16.vlgmr.msra.gmra.mrb[8].mxu1 %v3252_v1 }
  0x4b   : > { %2840 = vmatprep.mubr.msk.bf16.mxu1 %vm3254_vm1, %v3253_v8  ;;  %2837 = vmatpush3.bf16.msra.mxu1 %v2981_v58 }
  0x4c   : > { %2838 = vmatprep.subr.bf16.mxu1 %v3253_v8 }
  0x4f   : > { %2839 = vmatpush3.bf16.msra.mxu1 %v2982_v59 }
  0x50   : > { %2844 = vmatprep.subr.bf16.mxu1 %v3253_v8 }
 0x10d   : > { %v3444_v13 = vpop.f32.mrb[0].mxu1  ;;  %v3450_v16 = vpop.f32.mrb[0].mxu0 }
 0x10e   : > { %v3446_v14 = vpop.f32.mrb[1].mxu1  ;;  %v654_v18 = vpop.f32.mrb[1].mxu0  ;;  %v663_v10 = vadd.f32 %v3450_v16, %v3467_v25 }
 0x10f   : > { %v3448_v15 = vpop.f32.mrb[2].mxu1  ;;  %v3454_v19 = vpop.f32.mrb[2].mxu0  ;;  %v655_v26 = vadd.f32 %v3467_v25, %v654_v18 }
 0x110   : > { %v3452_v17 = vpop.f32.mrb[3].mxu1  ;;  %v657_v20 = vpop.f32.mrb[3].mxu0  ;;  %v666_v12 = vadd.f32 %v3454_v19, %v3467_v25 }
 0x111   : > { %v658_v28 = vadd.f32 %v3467_v25, %v657_v20 }
 0x115   : > { %v3456_v21 = vpop.f32.mrb[4].mxu1 }
 0x116   : > { %v3458_v22 = vpop.f32.mrb[5].mxu1 }
 0x117   : > { %v3460_v23 = vpop.f32.mrb[6].mxu1 }
 0x118   : > { %v3462_v24 = vpop.f32.mrb[7].mxu1 }
 0x11d   : > { %v790_v27 = vpop.f32.mrb[8].mxu1 }
 0x11e   : > { %v797_v29 = vadd.f32 %v790_v27, %v655_v26  ;;  %v2834_v30 = vpop.f32.mrb[9].mxu1 }
 0x11f   : > { %v793_v31 = vpop.f32.mrb[10].mxu1 }
 0x120   : > { %2999 = vtanh.f32 %v797_v29  ;;  %v798_v32 = vadd.f32 %v793_v31, %v658_v28  ;;  %v2835_v33 = vpop.f32.mrb[11].mxu1  ;;  %v2706_v38 = vmul.f32 -1.442695, %v797_v29 }
 0x122   : > { %3001 = vtanh.f32 %v798_v32  ;;  %v2707_v39 = vmul.f32 -1.442695, %v798_v32 }
 0x123   : > { %3003 = vpow2.f32 %v2706_v38 }
 0x124   : > { %3005 = vpow2.f32 %v2707_v39 }
 0x12a   : > { %v3000_v34 = vpop.eup %2999 }
 0x12b   : > { %817 = vrot.lane.b32.xlu0 %v3000_v34, %s3255_s26 }
 0x12c   : > { %v3002_v36 = vpop.eup %3001 }
 0x12d   : > { %v3004_v40 = vpop.eup %3003 }
 0x12e   : > { %v805_v41 = vadd.f32 1.0, %v3004_v40  ;;  %v3006_v42 = vpop.eup %3005 }
 0x12f   : > { %819 = vrot.lane.b32.xlu0 %v3002_v36, %s3255_s26  ;;  %v806_v43 = vadd.f32 1.0, %v3006_v42  ;;  %v984_v42 = vsel %vm982_vm6, 1, %v3252_v1 }
 0x130   : > { %3007 = vrcp.f32 %v805_v41 }
 0x131   : > { %3009 = vrcp.f32 %v806_v43  ;;  %v985_v43 = vsel %vm983_vm7, 1, %v3252_v1 }
 0x133   : > { %852 = vperm.xlu0 %2969, %v849_v37  }
 0x13a   : > { %v3008_v44 = vpop.eup %3007 }
 0x13b   : > { %v3010_v48 = vpop.eup %3009  ;;  %v813_v52 = vmul.f32 0.0, %v3008_v44 }
 0x13c   : > { %v814_v55 = vmul.f32 0.0, %v3010_v48 }
 0x19d   : > { %v818_v45 = vpop.permute.xlu0 %817 }
 0x19e   : > { %v823_v46 = vmul.f32 %v3008_v44, %v818_v45 }
 0x1a0   : > { %827 = vrot.lane.b32.xlu1 %v823_v46, %s3255_s26 }
 0x1a1   : > { %v820_v49 = vpop.permute.xlu0 %819 }
 0x1a2   : > { %v824_v50 = vmul.f32 %v3010_v48, %v820_v49 }
 0x1a4   : > { %829 = vrot.lane.b32.xlu1 %v824_v50, %s3255_s26 }
 0x1a8   : > { %855 = vperm.xlu1 %2970, %v850_v51  }
 0x1b2   : > { %v853_v63 = vpop.permute.xlu0 %852 }
 0x1b3   : > { %vm857_vm4 = vcmp.eq.s32.totalorder %v853_v63, 1 }
 0x212   : > { %v828_v53 = vpop.permute.xlu1 %827 }
 0x213   : > { %v3498_v54 = vadd.f32 %v828_v53, %v813_v52  ;;  %v2983_v53 = vld [vmem:[%s4326_s3] sm:$0xff]  }
 0x215   : > { %3011 = vtanh.f32 %v3498_v54 }
 0x216   : > { %v830_v56 = vpop.permute.xlu1 %829 }
 0x217   : > { %v3501_v57 = vadd.f32 %v830_v56, %v814_v55  ;;  %v2985_v55 = vld [vmem:[%s3403_s30 + $0x18] sm:$0xff]   ;;  %v2986_v56 = vld [vmem:[%s4326_s3 + $0x8] sm:$0xff]  }
 0x219   : > { %3013 = vtanh.f32 %v3501_v57 }
 0x21f   : > { %v3012_v60 = vpop.eup %3011 }
 0x220   : > { %839 = vrot.lane.b32.xlu1 %v3012_v60, %s3255_s26 }
 0x223   : > { %v3014_v61 = vpop.eup %3013 }
 0x224   : > { %841 = vrot.lane.b32.xlu0 %v3014_v61, %s3255_s26 }
 0x227   : > { %v856_v62 = vpop.permute.xlu1 %855 }
 0x228   : > { %vm858_vm5 = vcmp.eq.s32.totalorder %v856_v62, 1 }
 0x292   : > { %v840_v0 = vpop.permute.xlu1 %839 }
 0x293   : > { %v845_v2 = vmul.f32 %v3008_v44, %v840_v0  ;;  %v3545_v44 = vsel %vm857_vm4, %v3498_v54, 0.0  ;;  %v2984_v54 = vld [vmem:[%s3403_s30 + $0x10] sm:$0xff]   ;;  %s3257_s30 = smov 1  }
 0x294   : > { %2816 = vmatprep.mubr.msk.bf16.mxu0 %vm4342_vm0, %v2984_v54 }
 0x295   : > { %v3515_v5 = vsel %vm857_vm4, %v845_v2, 0.0  ;;  %2817 = vmatmul.mubr.msk.bf16.gmra.mrb[4].mxu0 %vm4342_vm0, %v2985_v55 }
 0x296   : > { %v842_v3 = vpop.permute.xlu0 %841  ;;  %2864 = vmatprep.mubr.msk.bf16.mxu0 %vm3254_vm1, %v3253_v8 }
 0x297   : > { %v846_v4 = vmul.f32 %v3010_v48, %v842_v3  ;;  %v3550_v48 = vsel %vm858_vm5, %v3501_v57, 0.0 }
 0x299   : > { %v3518_v6 = vsel %vm858_vm5, %v846_v4, 0.0 }
 0x29a   : > { %v863_v7 = vpack.c.bf16 %v3518_v6, %v3515_v5 }
 0x29c   : > { %865 = vrot.lane.b32.xlu1 %v863_v7, %s3256_s23 }
 0x30e   : > { %v866_v9 = vpop.permute.xlu1 %865 }
 0x30f   : > { %868 = vst.msk [vmem:[#allocation3] sm:$0xff] %vm4342_vm0, %v866_v9  ;;  %2841 = vmatmul.mubr.msk.bf16.vlgmr.msra.gmra.mrb[12].mxu1 %vm4342_vm0, %v866_v9 }
 0x310   : > { %2848 = vmatprep.mubr.msk.bf16.mxu1 %vm3254_vm1, %v3253_v8  ;;  %2845 = vmatpush3.bf16.msra.mxu1 %v2983_v53 }
 0x311   : > { %2846 = vmatprep.subr.bf16.mxu1 %v3253_v8 }
 0x314   : > { %2847 = vmatpush3.bf16.msra.mxu1 %v2986_v56 }
 0x315   : > { %2852 = vmatprep.subr.bf16.mxu1 %v3253_v8 }
 0x368   : > { %v3586_v7 = vpop.f32.mrb[4].mxu0 }
 0x369   : > { %v670_v9 = vpop.f32.mrb[5].mxu0 }
 0x3e2   : > { %v925_v11 = vpop.f32.mrb[12].mxu1 }
 0x3e3   : > { %v932_v18 = vadd.f32 %v925_v11, %v663_v10  ;;  %v2842_v20 = vpop.f32.mrb[13].mxu1  ;;  %v3588_v10 = vpop.f32.mrb[6].mxu0 }
 0x3e4   : > { %v928_v26 = vpop.f32.mrb[14].mxu1  ;;  %v673_v11 = vpop.f32.mrb[7].mxu0 }
 0x3e5   : > { %3015 = vtanh.f32 %v932_v18  ;;  %v933_v27 = vadd.f32 %v928_v26, %v666_v12  ;;  %v2843_v28 = vpop.f32.mrb[15].mxu1  ;;  %v2711_v31 = vmul.f32 -1.442695, %v932_v18  ;;  %v674_v18 = vadd.f32 %v3467_v25, %v673_v11 }
 0x3e7   : > { %3017 = vtanh.f32 %v933_v27  ;;  %v2712_v32 = vmul.f32 -1.442695, %v933_v27 }
 0x3e8   : > { %3019 = vpow2.f32 %v2711_v31 }
 0x3e9   : > { %3021 = vpow2.f32 %v2712_v32 }
 0x3ef   : > { %v3016_v29 = vpop.eup %3015 }
 0x3f0   : > { %952 = vrot.lane.b32.xlu0 %v3016_v29, %s3255_s26 }
 0x3f1   : > { %v3018_v30 = vpop.eup %3017 }
 0x3f2   : > { %954 = vrot.lane.b32.xlu1 %v3018_v30, %s3255_s26  ;;  %v3020_v16 = vpop.eup %3019 }
 0x3f3   : > { %v3022_v33 = vpop.eup %3021  ;;  %v940_v19 = vadd.f32 1.0, %v3020_v16 }
 0x3f4   : > { %v941_v34 = vadd.f32 1.0, %v3022_v33 }
 0x3f5   : > { %3023 = vrcp.f32 %v940_v19 }
 0x3f6   : > { %3025 = vrcp.f32 %v941_v34 }
 0x3ff   : > { %v3024_v36 = vpop.eup %3023 }
 0x400   : > { %v3026_v39 = vpop.eup %3025  ;;  %v948_v45 = vmul.f32 %v3024_v36, %v3545_v44 }
 0x401   : > { %v949_v50 = vmul.f32 %v3026_v39, %v3550_v48 }
 0x462   : > { %v953_v37 = vpop.permute.xlu0 %952 }
 0x463   : > { %v958_v38 = vmul.f32 %v3024_v36, %v953_v37 }
 0x464   : > { %v955_v40 = vpop.permute.xlu1 %954 }
 0x465   : > { %962 = vrot.lane.b32.xlu0 %v958_v38, %s3255_s26  ;;  %v959_v41 = vmul.f32 %v3026_v39, %v955_v40 }
 0x467   : > { %964 = vrot.lane.b32.xlu1 %v959_v41, %s3255_s26 }
 0x469   : > { %987 = vperm.xlu0 %2969, %v984_v42  }
 0x46b   : > { %990 = vperm.xlu1 %2970, %v985_v43   ;;  %v1120_v43 = vsel %vm1118_vm10, 1, %v3252_v1 }
 0x4d7   : > { %v963_v46 = vpop.permute.xlu0 %962 }
 0x4d8   : > { %v3552_v49 = vadd.f32 %v963_v46, %v948_v45  ;;  %v1121_v45 = vsel %vm1119_vm11, 1, %v3252_v1 }
 0x4d9   : > { %v965_v51 = vpop.permute.xlu1 %964 }
 0x4da   : > { %3027 = vtanh.f32 %v3552_v49  ;;  %v3556_v52 = vadd.f32 %v965_v51, %v949_v50 }
 0x4dc   : > { %3029 = vtanh.f32 %v3556_v52 }
 0x4e4   : > { %v3028_v57 = vpop.eup %3027 }
 0x4e5   : > { %974 = vrot.lane.b32.xlu0 %v3028_v57, %s3255_s26 }
 0x4e6   : > { %v3030_v58 = vpop.eup %3029 }
 0x4e7   : > { %976 = vrot.lane.b32.xlu1 %v3030_v58, %s3255_s26 }
 0x4e8   : > { %v988_v59 = vpop.permute.xlu0 %987 }
 0x4e9   : > { %vm992_vm8 = vcmp.eq.s32.totalorder %v988_v59, 1 }
 0x4ea   : > { %v991_v60 = vpop.permute.xlu1 %990  ;;  %v3611_v46 = vsel %vm992_vm8, %v3552_v49, %v3545_v44  ;;  %v2987_v44 = vld [vmem:[%s4326_s3] sm:$0xff]  }
 0x4eb   : > { %vm993_vm9 = vcmp.eq.s32.totalorder %v991_v60, 1 }
 0x4ec   : > { %v3617_v53 = vsel %vm993_vm9, %v3556_v52, %v3550_v48  ;;  %v2988_v48 = vld [vmem:[%s4326_s3 + $0x8] sm:$0xff]  }
 0x557   : > { %v975_v61 = vpop.permute.xlu0 %974 }
 0x558   : > { %v980_v62 = vmul.f32 %v3024_v36, %v975_v61 }
 0x559   : > { %v977_v63 = vpop.permute.xlu1 %976 }
 0x55a   : > { %v981_v0 = vmul.f32 %v3026_v39, %v977_v63  ;;  %v3577_v2 = vsel %vm992_vm8, %v980_v62, %v3515_v5  ;;  %v671_v5 = vadd.f32 %v3467_v25, %v670_v9  ;;  %vm1390_vm8 = vcmp.gt.s32.totalorder %v3481_v35, 4 }
 0x55c   : > { %v3581_v3 = vsel %vm993_vm9, %v981_v0, %v3518_v6  ;;  %vm4339_vm9 = vcmp.gt.s32.totalorder %v3490_v47, 4 }
 0x55d   : > { %v998_v4 = vpack.c.bf16 %v3581_v3, %v3577_v2 }
 0x55f   : > { %1000 = vrot.lane.b32.xlu0 %v998_v4, %s3256_s23 }
 0x5d1   : > { %v1001_v12 = vpop.permute.xlu0 %1000 }
 0x5d2   : > { %1004 = vst.msk [vmem:[#allocation3 + $0x8] sm:$0xff] %vm4342_vm0, %v1001_v12  ;;  %2849 = vmatmul.mubr.msk.bf16.vlgmr.msra.gmra.mrb[16].mxu1 %vm4342_vm0, %v1001_v12 }
 0x5d3   : > { %2856 = vmatprep.mubr.msk.bf16.mxu1 %vm3254_vm1, %v3253_v8  ;;  %2853 = vmatpush3.bf16.msra.mxu1 %v2987_v44 }
 0x5d4   : > { %2854 = vmatprep.subr.bf16.mxu1 %v3253_v8 }
 0x5d7   : > { %2855 = vmatpush3.bf16.msra.mxu1 %v2988_v48 }
 0x5d8   : > { %2868 = vmatprep.subr.bf16.mxu1 %v3253_v8 }
 0x6a5   : > { %v1061_v6 = vpop.f32.mrb[16].mxu1 }
 0x6a6   : > { %v1068_v20 = vadd.f32 %v1061_v6, %v671_v5  ;;  %v2850_v26 = vpop.f32.mrb[17].mxu1 }
 0x6a7   : > { %v1064_v27 = vpop.f32.mrb[18].mxu1 }
 0x6a8   : > { %3031 = vtanh.f32 %v1068_v20  ;;  %v1069_v28 = vadd.f32 %v1064_v27, %v674_v18  ;;  %v2851_v29 = vpop.f32.mrb[19].mxu1  ;;  %v2716_v32 = vmul.f32 -1.442695, %v1068_v20 }
 0x6aa   : > { %3033 = vtanh.f32 %v1069_v28  ;;  %v2717_v16 = vmul.f32 -1.442695, %v1069_v28 }
 0x6ab   : > { %3035 = vpow2.f32 %v2716_v32 }
 0x6ac   : > { %3037 = vpow2.f32 %v2717_v16 }
 0x6b2   : > { %v3032_v30 = vpop.eup %3031 }
 0x6b3   : > { %1088 = vrot.lane.b32.xlu1 %v3032_v30, %s3255_s26 }
 0x6b4   : > { %v3034_v31 = vpop.eup %3033 }
 0x6b5   : > { %1090 = vrot.lane.b32.xlu0 %v3034_v31, %s3255_s26  ;;  %v3036_v33 = vpop.eup %3035 }
 0x6b6   : > { %v3038_v19 = vpop.eup %3037  ;;  %v1076_v34 = vadd.f32 1.0, %v3036_v33 }
 0x6b7   : > { %v1077_v36 = vadd.f32 1.0, %v3038_v19 }
 0x6b8   : > { %3039 = vrcp.f32 %v1076_v34 }
 0x6b9   : > { %3041 = vrcp.f32 %v1077_v36 }
 0x6c2   : > { %v3040_v37 = vpop.eup %3039 }
 0x6c3   : > { %v3042_v40 = vpop.eup %3041  ;;  %v1084_v50 = vmul.f32 %v3040_v37, %v3611_v46 }
 0x6c4   : > { %v1085_v55 = vmul.f32 %v3042_v40, %v3617_v53 }
 0x725   : > { %v1089_v38 = vpop.permute.xlu1 %1088 }
 0x726   : > { %v1094_v39 = vmul.f32 %v3040_v37, %v1089_v38  ;;  %v1256_v38 = vsel %vm1254_vm14, 1, %v3252_v1 }
 0x727   : > { %v1091_v41 = vpop.permute.xlu0 %1090 }
 0x728   : > { %1098 = vrot.lane.b32.xlu1 %v1094_v39, %s3255_s26  ;;  %v1095_v42 = vmul.f32 %v3042_v40, %v1091_v41  ;;  %v1257_v39 = vsel %vm1255_vm15, 1, %v3252_v1 }
 0x72a   : > { %1100 = vrot.lane.b32.xlu0 %v1095_v42, %s3255_s26 }
 0x72c   : > { %1123 = vperm.xlu1 %2970, %v1120_v43  }
 0x72e   : > { %1126 = vperm.xlu0 %2969, %v1121_v45  }
 0x79a   : > { %v1099_v51 = vpop.permute.xlu1 %1098 }
 0x79b   : > { %v3619_v54 = vadd.f32 %v1099_v51, %v1084_v50 }
 0x79c   : > { %v1101_v56 = vpop.permute.xlu0 %1100 }
 0x79d   : > { %3043 = vtanh.f32 %v3619_v54  ;;  %v3623_v57 = vadd.f32 %v1101_v56, %v1085_v55 }
 0x79f   : > { %3045 = vtanh.f32 %v3623_v57 }
 0x7a7   : > { %v3044_v49 = vpop.eup %3043 }
 0x7a8   : > { %1110 = vrot.lane.b32.xlu1 %v3044_v49, %s3255_s26 }
 0x7a9   : > { %v3046_v52 = vpop.eup %3045 }
 0x7aa   : > { %1112 = vrot.lane.b32.xlu0 %v3046_v52, %s3255_s26 }
 0x7ab   : > { %v1124_v58 = vpop.permute.xlu1 %1123 }
 0x7ac   : > { %vm1128_vm12 = vcmp.eq.s32.totalorder %v1124_v58, 1 }
 0x7ad   : > { %v1127_v59 = vpop.permute.xlu0 %1126 }
 0x7ae   : > { %vm1129_vm13 = vcmp.eq.s32.totalorder %v1127_v59, 1 }
 0x7af   : > { %v3676_v43 = vsel %vm1129_vm13, %v3623_v57, %v3617_v53  ;;  %v2990_v53 = vld [vmem:[%s4326_s3 + $0x8] sm:$0xff]  }
 0x81a   : > { %v1111_v60 = vpop.permute.xlu1 %1110 }
 0x81b   : > { %v1116_v61 = vmul.f32 %v3040_v37, %v1111_v60 }
 0x81c   : > { %v1113_v62 = vpop.permute.xlu0 %1112 }
 0x81d   : > { %v1117_v63 = vmul.f32 %v3042_v40, %v1113_v62  ;;  %v3638_v0 = vsel %vm1128_vm12, %v1116_v61, %v3577_v2  ;;  %v679_v2 = vadd.f32 %v3586_v7, %v3467_v25  ;;  %v3670_v40 = vsel %vm1128_vm12, %v3619_v54, %v3611_v46  ;;  %v2989_v46 = vld [vmem:[%s4326_s3] sm:$0xff]  }
 0x81e   : > { %2861 = vmatpush3.bf16.msra.mxu0 %v2989_v46 }
 0x81f   : > { %v3642_v4 = vsel %vm1129_vm13, %v1117_v63, %v3581_v3  ;;  %v682_v3 = vadd.f32 %v3588_v10, %v3467_v25  ;;  %2862 = vmatprep.subr.bf16.mxu0 %v3253_v8  ;;  %v687_v63 = vadd.f32 %v3467_v25, %v3446_v14 }
 0x820   : > { %v1134_v9 = vpack.c.bf16 %v3642_v4, %v3638_v0 }
 0x822   : > { %1136 = vrot.lane.b32.xlu1 %v1134_v9, %s3256_s23  ;;  %2863 = vmatpush3.bf16.msra.mxu0 %v2990_v53 }
 0x823   : > { %2876 = vmatprep.subr.bf16.mxu0 %v3253_v8 }
 0x894   : > { %v1137_v11 = vpop.permute.xlu1 %1136 }
 0x895   : > { %1140 = vst.msk [vmem:[#allocation3 + $0x10] sm:$0xff] %vm4342_vm0, %v1137_v11  ;;  %2857 = vmatmul.mubr.msk.bf16.vlgmr.msra.gmra.mrb[20].mxu1 %vm4342_vm0, %v1137_v11 }
 0x896   : > { %2872 = vmatprep.mubr.msk.bf16.mxu1 %vm3254_vm1, %v3253_v8 }
 0x968   : > { %v1197_v12 = vpop.f32.mrb[20].mxu1 }
 0x969   : > { %v1204_v5 = vadd.f32 %v1197_v12, %v679_v2  ;;  %v2858_v6 = vpop.f32.mrb[21].mxu1 }
 0x96a   : > { %v1200_v18 = vpop.f32.mrb[22].mxu1 }
 0x96b   : > { %3047 = vtanh.f32 %v1204_v5  ;;  %v1205_v20 = vadd.f32 %v1200_v18, %v682_v3  ;;  %v2859_v26 = vpop.f32.mrb[23].mxu1  ;;  %v2721_v29 = vmul.f32 -1.442695, %v1204_v5 }
 0x96d   : > { %3049 = vtanh.f32 %v1205_v20  ;;  %v2722_v30 = vmul.f32 -1.442695, %v1205_v20 }
 0x96e   : > { %3051 = vpow2.f32 %v2721_v29 }
 0x96f   : > { %3053 = vpow2.f32 %v2722_v30 }
 0x975   : > { %v3048_v27 = vpop.eup %3047 }
 0x976   : > { %1224 = vrot.lane.b32.xlu0 %v3048_v27, %s3255_s26 }
 0x977   : > { %v3050_v28 = vpop.eup %3049 }
 0x978   : > { %1226 = vrot.lane.b32.xlu1 %v3050_v28, %s3255_s26  ;;  %v3052_v7 = vpop.eup %3051 }
 0x979   : > { %v3054_v31 = vpop.eup %3053  ;;  %v1212_v10 = vadd.f32 1.0, %v3052_v7 }
 0x97a   : > { %v1213_v32 = vadd.f32 1.0, %v3054_v31 }
 0x97b   : > { %3055 = vrcp.f32 %v1212_v10 }
 0x97c   : > { %3057 = vrcp.f32 %v1213_v32  ;;  %v1392_v32 = vsel %vm1390_vm8, 1, %v3252_v1 }
 0x985   : > { %v3056_v16 = vpop.eup %3055 }
 0x986   : > { %v3058_v34 = vpop.eup %3057  ;;  %v1220_v41 = vmul.f32 %v3056_v16, %v3670_v40 }
 0x987   : > { %v1221_v50 = vmul.f32 %v3058_v34, %v3676_v43 }
 0x9e8   : > { %v1225_v33 = vpop.permute.xlu0 %1224 }
 0x9e9   : > { %v1230_v19 = vmul.f32 %v3056_v16, %v1225_v33 }
 0x9ea   : > { %v1227_v36 = vpop.permute.xlu1 %1226 }
 0x9eb   : > { %1234 = vrot.lane.b32.xlu0 %v1230_v19, %s3255_s26  ;;  %v1231_v37 = vmul.f32 %v3058_v34, %v1227_v36 }
 0x9ed   : > { %1236 = vrot.lane.b32.xlu1 %v1231_v37, %s3255_s26 }
 0x9ef   : > { %1259 = vperm.xlu0 %2969, %v1256_v38  }
 0x9f1   : > { %1262 = vperm.xlu1 %2970, %v1257_v39  }
 0xa5d   : > { %v1235_v42 = vpop.permute.xlu0 %1234 }
 0xa5e   : > { %v3678_v45 = vadd.f32 %v1235_v42, %v1220_v41  ;;  %v2992_v42 = vld [vmem:[%s4326_s3 + $0x8] sm:$0xff]  }
 0xa5f   : > { %v1237_v51 = vpop.permute.xlu1 %1236 }
 0xa60   : > { %3059 = vtanh.f32 %v3678_v45  ;;  %v3682_v55 = vadd.f32 %v1237_v51, %v1221_v50 }
 0xa62   : > { %3061 = vtanh.f32 %v3682_v55 }
 0xa6a   : > { %v3060_v54 = vpop.eup %3059 }
 0xa6b   : > { %1246 = vrot.lane.b32.xlu0 %v3060_v54, %s3255_s26 }
 0xa6c   : > { %v3062_v56 = vpop.eup %3061 }
 0xa6d   : > { %1248 = vrot.lane.b32.xlu1 %v3062_v56, %s3255_s26 }
 0xa6e   : > { %v1260_v57 = vpop.permute.xlu0 %1259 }
 0xa6f   : > { %vm1264_vm4 = vcmp.eq.s32.totalorder %v1260_v57, 1 }
 0xa70   : > { %v1263_v44 = vpop.permute.xlu1 %1262  ;;  %v3729_v33 = vsel %vm1264_vm4, %v3678_v45, %v3670_v40  ;;  %v2991_v40 = vld [vmem:[%s4326_s3] sm:$0xff]  }
 0xa71   : > { %vm1265_vm5 = vcmp.eq.s32.totalorder %v1263_v44, 1  ;;  %2869 = vmatpush3.bf16.msra.mxu1 %v2991_v40 }
 0xa72   : > { %v3735_v36 = vsel %vm1265_vm5, %v3682_v55, %v3676_v43  ;;  %2870 = vmatprep.subr.bf16.mxu1 %v3253_v8 }
 0xa75   : > { %2871 = vmatpush3.bf16.msra.mxu1 %v2992_v42 }
 0xa76   : > { %2884 = vmatprep.subr.bf16.mxu1 %v3253_v8 }
 0xadd   : > { %v1247_v48 = vpop.permute.xlu0 %1246 }
 0xade   : > { %v1252_v49 = vmul.f32 %v3056_v16, %v1247_v48  ;;  %v1393_v16 = vsel %vm4339_vm9, 1, %v3252_v1  ;;  %vm4340_vm9 = vcmp.gt.s32.totalorder %v3490_v47, 6 }
 0xadf   : > { %v1249_v52 = vpop.permute.xlu1 %1248 }
 0xae0   : > { %v1253_v58 = vmul.f32 %v3058_v34, %v1249_v52  ;;  %v3697_v59 = vsel %vm1264_vm4, %v1252_v49, %v3638_v0  ;;  %v695_v49 = vadd.f32 %v3444_v13, %v3467_v25  ;;  %vm1527_vm4 = vcmp.gt.s32.totalorder %v3490_v47, 5 }
 0xae2   : > { %v3701_v60 = vsel %vm1265_vm5, %v1253_v58, %v3642_v4  ;;  %v690_v4 = vadd.f32 %v3467_v25, %v3452_v17  ;;  %v698_v58 = vadd.f32 %v3448_v15, %v3467_v25 }
 0xae3   : > { %v1270_v61 = vpack.c.bf16 %v3701_v60, %v3697_v59 }
 0xae5   : > { %1272 = vrot.lane.b32.xlu0 %v1270_v61, %s3256_s23 }
 0xb57   : > { %v1273_v62 = vpop.permute.xlu0 %1272 }
 0xb58   : > { %1276 = vst.msk [vmem:[#allocation3 + $0x18] sm:$0xff] %vm4342_vm0, %v1273_v62  ;;  %2865 = vmatmul.mubr.msk.bf16.vlgmr.msra.gmra.mrb[8].mxu0 %vm4342_vm0, %v1273_v62 }
 0xb59   : > { %2880 = vmatprep.mubr.msk.bf16.mxu0 %vm3254_vm1, %v3253_v8 }
 0xc2b   : > { %v1333_v0 = vpop.f32.mrb[8].mxu0 }
 0xc2c   : > { %v1340_v9 = vadd.f32 %v1333_v0, %v687_v63  ;;  %v2866_v11 = vpop.f32.mrb[9].mxu0 }
 0xc2d   : > { %v1336_v2 = vpop.f32.mrb[10].mxu0 }
 0xc2e   : > { %3063 = vtanh.f32 %v1340_v9  ;;  %v1341_v12 = vadd.f32 %v1336_v2, %v690_v4  ;;  %v2867_v3 = vpop.f32.mrb[11].mxu0  ;;  %v2726_v18 = vmul.f32 -1.442695, %v1340_v9 }
 0xc30   : > { %3065 = vtanh.f32 %v1341_v12  ;;  %v2727_v20 = vmul.f32 -1.442695, %v1341_v12 }
 0xc31   : > { %3067 = vpow2.f32 %v2726_v18 }
 0xc32   : > { %3069 = vpow2.f32 %v2727_v20 }
 0xc38   : > { %v3064_v5 = vpop.eup %3063 }
 0xc39   : > { %1360 = vrot.lane.b32.xlu1 %v3064_v5, %s3255_s26 }
 0xc3a   : > { %v3066_v6 = vpop.eup %3065 }
 0xc3b   : > { %1362 = vrot.lane.b32.xlu0 %v3066_v6, %s3255_s26  ;;  %v3068_v14 = vpop.eup %3067 }
 0xc3c   : > { %v3070_v26 = vpop.eup %3069  ;;  %v1348_v17 = vadd.f32 1.0, %v3068_v14 }
 0xc3d   : > { %v1349_v27 = vadd.f32 1.0, %v3070_v26 }
 0xc3e   : > { %3071 = vrcp.f32 %v1348_v17  ;;  %v1529_v17 = vsel %vm1527_vm4, 1, %v3252_v1 }
 0xc3f   : > { %3073 = vrcp.f32 %v1349_v27 }
 0xc48   : > { %v3072_v28 = vpop.eup %3071 }
 0xc49   : > { %v3074_v7 = vpop.eup %3073  ;;  %v1356_v19 = vmul.f32 %v3072_v28, %v3729_v33 }
 0xc4a   : > { %v1357_v38 = vmul.f32 %v3074_v7, %v3735_v36 }
 0xcab   : > { %v1361_v29 = vpop.permute.xlu1 %1360 }
 0xcac   : > { %v1366_v30 = vmul.f32 %v3072_v28, %v1361_v29 }
 0xcad   : > { %v1363_v31 = vpop.permute.xlu0 %1362 }
 0xcae   : > { %1370 = vrot.lane.b32.xlu1 %v1366_v30, %s3255_s26  ;;  %v1367_v10 = vmul.f32 %v3074_v7, %v1363_v31 }
 0xcb0   : > { %1372 = vrot.lane.b32.xlu0 %v1367_v10, %s3255_s26 }
 0xcb2   : > { %1395 = vperm.xlu1 %2970, %v1392_v32  }
 0xcb4   : > { %1398 = vperm.xlu0 %2969, %v1393_v16   ;;  %v2993_v16 = vld [vmem:[%s4326_s3] sm:$0xff]  }
 0xcb5   : > { %2877 = vmatpush3.bf16.msra.mxu0 %v2993_v16 }
 0xcb6   : > { %2878 = vmatprep.subr.bf16.mxu0 %v3253_v8 }
 0xd20   : > { %v1371_v34 = vpop.permute.xlu1 %1370 }
 0xd21   : > { %v3737_v37 = vadd.f32 %v1371_v34, %v1356_v19 }
 0xd22   : > { %v1373_v39 = vpop.permute.xlu0 %1372 }
 0xd23   : > { %3075 = vtanh.f32 %v3737_v37  ;;  %v3741_v41 = vadd.f32 %v1373_v39, %v1357_v38 }
 0xd25   : > { %3077 = vtanh.f32 %v3741_v41 }
 0xd2d   : > { %v3076_v43 = vpop.eup %3075 }
 0xd2e   : > { %1382 = vrot.lane.b32.xlu1 %v3076_v43, %s3255_s26 }
 0xd2f   : > { %v3078_v45 = vpop.eup %3077 }
 0xd30   : > { %1384 = vrot.lane.b32.xlu0 %v3078_v45, %s3255_s26 }
 0xd31   : > { %v1396_v50 = vpop.permute.xlu1 %1395 }
 0xd32   : > { %vm1400_vm12 = vcmp.eq.s32.totalorder %v1396_v50, 1 }
 0xd33   : > { %v1399_v51 = vpop.permute.xlu0 %1398  ;;  %v3788_v27 = vsel %vm1400_vm12, %v3737_v37, %v3729_v33  ;;  %v2994_v33 = vld [vmem:[%s4326_s3 + $0x8] sm:$0xff]  }
 0xd34   : > { %vm1401_vm13 = vcmp.eq.s32.totalorder %v1399_v51, 1  ;;  %2879 = vmatpush3.bf16.msra.mxu0 %v2994_v33  ;;  %v2996_v51 = vld [vmem:[%s4328_s5 + $0x8] sm:$0xff]  }
 0xd35   : > { %v3794_v30 = vsel %vm1401_vm13, %v3741_v41, %v3735_v36  ;;  %v2995_v36 = vld [vmem:[%s4328_s5] sm:$0xff]  }
 0xd36   : > { %2892 = vmatprep.subr.bf16.mxu0 %v2995_v36 }
 0xda0   : > { %v1383_v55 = vpop.permute.xlu1 %1382 }
 0xda1   : > { %v1388_v46 = vmul.f32 %v3072_v28, %v1383_v55 }
 0xda2   : > { %v1385_v53 = vpop.permute.xlu0 %1384 }
 0xda3   : > { %v1389_v54 = vmul.f32 %v3074_v7, %v1385_v53  ;;  %v3756_v56 = vsel %vm1400_vm12, %v1388_v46, %v3697_v59  ;;  %v3839_v46 = vld [vmem:[#allocation3] sm:$0xff]  ;;  %v3843_v53 = vld [vmem:[#allocation3 + $0x8] sm:$0xff] }
 0xda5   : > { %v3760_v57 = vsel %vm1401_vm13, %v1389_v54, %v3701_v60  ;;  %v3847_v54 = vld [vmem:[#allocation3 + $0x10] sm:$0xff]  ;;  %vm4341_vm13 = vcmp.gt.s32.totalorder %v3481_v35, 6 }
 0xda6   : > { %v1406_v44 = vpack.c.bf16 %v3760_v57, %v3756_v56 }
 0xda8   : > { %1408 = vrot.lane.b32.xlu1 %v1406_v44, %s3256_s23 }
 0xe1a   : > { %v1409_v48 = vpop.permute.xlu1 %1408 }
 0xe1b   : > { %1412 = vst.msk [vmem:[#allocation3 + $0x20] sm:$0xff] %vm4342_vm0, %v1409_v48  ;;  %2873 = vmatmul.mubr.msk.bf16.vlgmr.msra.gmra.mrb[24].mxu1 %vm4342_vm0, %v1409_v48  ;;  %v703_v48 = vadd.f32 %v3467_v25, %v3458_v22 }
 0xe1c   : > { %2888 = vmatprep.mubr.msk.bf16.mxu1 %vm3254_vm1, %v3253_v8  ;;  %vm1526_vm1 = vcmp.gt.s32.totalorder %v3481_v35, 5 }
 0xe1d   : > { %v1528_v26 = vsel %vm1526_vm1, 1, %v3252_v1 }
 0xeee   : > { %v1469_v52 = vpop.f32.mrb[24].mxu1 }
 0xeef   : > { %v1476_v59 = vadd.f32 %v1469_v52, %v695_v49  ;;  %v2874_v60 = vpop.f32.mrb[25].mxu1  ;;  %v706_v52 = vadd.f32 %v3467_v25, %v3462_v24 }
 0xef0   : > { %v1472_v61 = vpop.f32.mrb[26].mxu1 }
 0xef1   : > { %3079 = vtanh.f32 %v1476_v59  ;;  %v1477_v62 = vadd.f32 %v1472_v61, %v698_v58  ;;  %v2875_v63 = vpop.f32.mrb[27].mxu1  ;;  %v2731_v9 = vmul.f32 -1.442695, %v1476_v59 }
 0xef3   : > { %3081 = vtanh.f32 %v1477_v62  ;;  %v2732_v11 = vmul.f32 -1.442695, %v1477_v62 }
 0xef4   : > { %3083 = vpow2.f32 %v2731_v9 }
 0xef5   : > { %3085 = vpow2.f32 %v2732_v11 }
 0xefb   : > { %v3080_v0 = vpop.eup %3079 }
 0xefc   : > { %1496 = vrot.lane.b32.xlu0 %v3080_v0, %s3255_s26 }
 0xefd   : > { %v3082_v4 = vpop.eup %3081 }
 0xefe   : > { %1498 = vrot.lane.b32.xlu1 %v3082_v4, %s3255_s26  ;;  %v3084_v13 = vpop.eup %3083 }
 0xeff   : > { %v3086_v2 = vpop.eup %3085  ;;  %v1484_v15 = vadd.f32 1.0, %v3084_v13 }
 0xf00   : > { %v1485_v12 = vadd.f32 1.0, %v3086_v2 }
 0xf01   : > { %3087 = vrcp.f32 %v1484_v15 }
 0xf02   : > { %3089 = vrcp.f32 %v1485_v12 }
 0xf0b   : > { %v3088_v3 = vpop.eup %3087 }
 0xf0c   : > { %v3090_v18 = vpop.eup %3089  ;;  %v1492_v28 = vmul.f32 %v3088_v3, %v3788_v27 }
 0xf0d   : > { %v1493_v31 = vmul.f32 %v3090_v18, %v3794_v30 }
 0xf6e   : > { %v1497_v5 = vpop.permute.xlu0 %1496 }
 0xf6f   : > { %v1502_v6 = vmul.f32 %v3088_v3, %v1497_v5 }
 0xf70   : > { %v1499_v20 = vpop.permute.xlu1 %1498 }
 0xf71   : > { %1506 = vrot.lane.b32.xlu0 %v1502_v6, %s3255_s26  ;;  %v1503_v14 = vmul.f32 %v3090_v18, %v1499_v20 }
 0xf73   : > { %1508 = vrot.lane.b32.xlu1 %v1503_v14, %s3255_s26 }
 0xf75   : > { %1531 = vperm.xlu0 %2969, %v1528_v26  }
 0xf77   : > { %1534 = vperm.xlu1 %2970, %v1529_v17  }
 0xfe3   : > { %v1507_v29 = vpop.permute.xlu0 %1506 }
 0xfe4   : > { %v3796_v7 = vadd.f32 %v1507_v29, %v1492_v28 }
 0xfe5   : > { %v1509_v10 = vpop.permute.xlu1 %1508 }
 0xfe6   : > { %3091 = vtanh.f32 %v3796_v7  ;;  %v3800_v32 = vadd.f32 %v1509_v10, %v1493_v31 }
 0xfe8   : > { %3093 = vtanh.f32 %v3800_v32 }
 0xff0   : > { %v3092_v19 = vpop.eup %3091 }
 0xff1   : > { %1518 = vrot.lane.b32.xlu0 %v3092_v19, %s3255_s26  ;;  %v1664_v19 = vsel %vm4341_vm13, 1, %v3252_v1 }
 0xff2   : > { %v3094_v34 = vpop.eup %3093 }
 0xff3   : > { %1520 = vrot.lane.b32.xlu1 %v3094_v34, %s3255_s26  ;;  %v1665_v34 = vsel %vm4340_vm9, 1, %v3252_v1 }
 0xff4   : > { %v3815_v37 = vpop.permute.xlu0 %1531 }
 0xff5   : > { %vm1536_vm5 = vcmp.eq.s32.totalorder %v3815_v37, 1 }
 0xff6   : > { %v3817_v38 = vpop.permute.xlu1 %1534 }
 0xff7   : > { %vm1537_vm12 = vcmp.eq.s32.totalorder %v3817_v38, 1 }
0x1063   : > { %v1519_v39 = vpop.permute.xlu0 %1518 }
0x1064   : > { %v1524_v41 = vmul.f32 %v3088_v3, %v1519_v39 }
0x1065   : > { %v1521_v40 = vpop.permute.xlu1 %1520 }
0x1066   : > { %v1525_v42 = vmul.f32 %v3090_v18, %v1521_v40  ;;  %v3824_v43 = vsel %vm1536_vm5, %v1524_v41, %v3756_v56  ;;  %v3851_v56 = vld [vmem:[#allocation3 + $0x18] sm:$0xff]  ;;  %v3911_v40 = vsel %vm1537_vm12, %v3800_v32, %v3794_v30  ;;  %v2998_v30 = vld [vmem:[%s4326_s3 + $0x8] sm:$0xff]  }
0x1068   : > { %v3829_v45 = vsel %vm1537_vm12, %v1525_v42, %v3760_v57  ;;  %v3855_v57 = vld [vmem:[#allocation3 + $0x20] sm:$0xff] }
0x1069   : > { %v1542_v50 = vpack.c.bf16 %v3829_v45, %v3824_v43 }
0x106b   : > { %1544 = vrot.lane.b32.xlu0 %v1542_v50, %s3256_s23 }
0x10dd   : > { %v1545_v55 = vpop.permute.xlu0 %1544 }
0x10de   : > { %1548 = vst.msk [vmem:[#allocation3 + $0x28] sm:$0xff] %vm4342_vm0, %v1545_v55  ;;  %2881 = vmatmul.mubr.msk.bf16.vlgmr.msra.gmra.mrb[12].mxu0 %vm4342_vm0, %v1545_v55 }
0x10df   : > { %2893 = vmatpush3.bf16.msra.mxu0 %v2995_v36  ;;  %2896 = vmatprep.mubr.msk.bf16.mxu0 %vm4342_vm0, %v3839_v46  ;;  %v3904_v36 = vsel %vm1536_vm5, %v3796_v7, %v3788_v27  ;;  %v2997_v27 = vld [vmem:[%s4326_s3] sm:$0xff]  }
0x10e0   : > { %2894 = vmatprep.subr.bf16.mxu0 %v2996_v51  ;;  %2885 = vmatpush3.bf16.msra.mxu1 %v2997_v27  ;;  %v3968_v27 = vld [vmem:[%s3478_s27 + $0x8] sm:$0xff] }
0x10e1   : > { %2886 = vmatprep.subr.bf16.mxu1 %v3253_v8  ;;  %vm1799_vm13 = vcmp.gt.s32.totalorder %v3968_v27, 7 }
0x10e3   : > { %2895 = vmatpush3.bf16.msra.mxu0 %v2996_v51 }
0x10e4   : > { %2887 = vmatpush3.bf16.msra.mxu1 %v2998_v30  ;;  %v1801_v30 = vsel %vm1799_vm13, 1, %v3252_v1 }
0x10e5   : > { %v1824_v44 = vld [vmem:[#allocation3 + $0x28] sm:$0xff] }
0x10e6   : > { %2897 = vmatmul.mubr.msk.bf16.vlgmr.msra.gmra.mrb[16].mxu0 %vm4342_vm0, %v3843_v53 }
0x10e7   : > { %2900 = vmatprep.mubr.msk.bf16.mxu0 %vm4342_vm0, %v3847_v54 }
0x10ee   : > { %2901 = vmatmul.mubr.msk.bf16.gmra.mrb[20].mxu0 %vm4342_vm0, %v3851_v56 }
0x10ef   : > { %2904 = vmatprep.mubr.msk.bf16.mxu0 %vm4342_vm0, %v3855_v57 }
0x10f6   : > { %2905 = vmatmul.mubr.msk.bf16.gmra.mrb[24].mxu0 %vm4342_vm0, %v1824_v44 }
0x11b1   : > { %v1605_v49 = vpop.f32.mrb[12].mxu0 }
0x11b2   : > { %v1612_v58 = vadd.f32 %v1605_v49, %v703_v48  ;;  %v2882_v59 = vpop.f32.mrb[13].mxu0 }
0x11b3   : > { %v1608_v60 = vpop.f32.mrb[14].mxu0 }
0x11b4   : > { %3095 = vtanh.f32 %v1612_v58  ;;  %v1613_v61 = vadd.f32 %v1608_v60, %v706_v52  ;;  %v2883_v62 = vpop.f32.mrb[15].mxu0  ;;  %v2736_v6 = vmul.f32 -1.442695, %v1612_v58 }
0x11b6   : > { %3097 = vtanh.f32 %v1613_v61  ;;  %v2737_v18 = vmul.f32 -1.442695, %v1613_v61 }
0x11b7   : > { %3099 = vpow2.f32 %v2736_v6 }
0x11b8   : > { %3101 = vpow2.f32 %v2737_v18 }
0x11b9   : > { %v3864_v63 = vpop.f32.mrb[16].mxu0 }
0x11ba   : > { %v3866_v0 = vpop.f32.mrb[17].mxu0 }
0x11bb   : > { %v3868_v4 = vpop.f32.mrb[18].mxu0 }
0x11bc   : > { %v3870_v9 = vpop.f32.mrb[19].mxu0 }
0x11be   : > { %v3096_v22 = vpop.eup %3095 }
0x11bf   : > { %1632 = vrot.lane.b32.xlu1 %v3096_v22, %s3255_s26 }
0x11c0   : > { %v3098_v11 = vpop.eup %3097 }
0x11c1   : > { %v3873_v24 = vpop.f32.mrb[20].mxu0  ;;  %1634 = vrot.lane.b32.xlu0 %v3098_v11, %s3255_s26  ;;  %v3100_v20 = vpop.eup %3099 }
0x11c2   : > { %v3876_v25 = vpop.f32.mrb[21].mxu0  ;;  %v3102_v14 = vpop.eup %3101  ;;  %v1620_v26 = vadd.f32 1.0, %v3100_v20 }
0x11c3   : > { %v3878_v13 = vpop.f32.mrb[22].mxu0  ;;  %v1621_v17 = vadd.f32 1.0, %v3102_v14 }
0x11c4   : > { %v3880_v2 = vpop.f32.mrb[23].mxu0  ;;  %3103 = vrcp.f32 %v1620_v26 }
0x11c5   : > { %3105 = vrcp.f32 %v1621_v17 }
0x11c9   : > { %v3882_v15 = vpop.f32.mrb[24].mxu0 }
0x11ca   : > { %v3884_v12 = vpop.f32.mrb[25].mxu0 }
0x11cb   : > { %v3886_v3 = vpop.f32.mrb[26].mxu0 }
0x11cc   : > { %v3888_v5 = vpop.f32.mrb[27].mxu0 }
0x11ce   : > { %v3104_v28 = vpop.eup %3103 }
0x11cf   : > { %v3106_v10 = vpop.eup %3105  ;;  %v1628_v39 = vmul.f32 %v3104_v28, %v3904_v36 }
0x11d0   : > { %v1629_v50 = vmul.f32 %v3106_v10, %v3911_v40 }
0x1231   : > { %v1633_v29 = vpop.permute.xlu1 %1632 }
0x1232   : > { %v1638_v31 = vmul.f32 %v3104_v28, %v1633_v29 }
0x1233   : > { %v1635_v16 = vpop.permute.xlu0 %1634 }
0x1234   : > { %1642 = vrot.lane.b32.xlu1 %v1638_v31, %s3255_s26  ;;  %v1639_v33 = vmul.f32 %v3106_v10, %v1635_v16 }
0x1236   : > { %1644 = vrot.lane.b32.xlu0 %v1639_v33, %s3255_s26 }
0x1238   : > { %1667 = vperm.xlu1 %2970, %v1664_v19  }
0x123a   : > { %1670 = vperm.xlu0 %2969, %v1665_v34   ;;  %v3957_v34 = vld [vmem:[%s3478_s27] sm:$0xff] }
0x123b   : > { %vm1798_vm9 = vcmp.gt.s32.totalorder %v3957_v34, 7 }
0x12a6   : > { %v1643_v41 = vpop.permute.xlu1 %1642 }
0x12a7   : > { %v3913_v42 = vadd.f32 %v1643_v41, %v1628_v39 }
0x12a8   : > { %v1645_v51 = vpop.permute.xlu0 %1644 }
0x12a9   : > { %3107 = vtanh.f32 %v3913_v42  ;;  %v3917_v55 = vadd.f32 %v1645_v51, %v1629_v50  ;;  %v1800_v51 = vsel %vm1798_vm9, 1, %v3252_v1 }
0x12ab   : > { %3109 = vtanh.f32 %v3917_v55 }
0x12b3   : > { %v3108_v7 = vpop.eup %3107 }
0x12b4   : > { %1654 = vrot.lane.b32.xlu1 %v3108_v7, %s3255_s26 }
0x12b5   : > { %v3110_v32 = vpop.eup %3109 }
0x12b6   : > { %1656 = vrot.lane.b32.xlu0 %v3110_v32, %s3255_s26 }
0x12b7   : > { %v1668_v37 = vpop.permute.xlu1 %1667 }
0x12b8   : > { %vm1672_vm5 = vcmp.eq.s32.totalorder %v1668_v37, 1 }
0x12b9   : > { %v1671_v38 = vpop.permute.xlu0 %1670  ;;  %v1676_v7 = vsel %vm1672_vm5, %v3913_v42, %v3904_v36  ;;  %v3988_v36 = vld [vmem:[%s4329_s6] ss:$0 sm:$0xff] }
0x12ba   : > { %vm1673_vm12 = vcmp.eq.s32.totalorder %v1671_v38, 1  ;;  %v1933_v42 = vadd.f32 %v3873_v24, %v3988_v36  ;;  %v1936_v37 = vadd.f32 %v3878_v13, %v3988_v36 }
0x1326   : > { %v1655_v44 = vpop.permute.xlu1 %1654 }
0x1327   : > { %v1660_v48 = vmul.f32 %v3104_v28, %v1655_v44 }
0x1328   : > { %v1657_v49 = vpop.permute.xlu0 %1656 }
0x1329   : > { %v1661_v52 = vmul.f32 %v3106_v10, %v1657_v49  ;;  %v3931_v58 = vsel %vm1672_vm5, %v1660_v48, %v3824_v43  ;;  %v3203_v43 = vld [vmem:[%s4327_s4] ss:$0 sm:$0xff]  ;;  %v1677_v48 = vsel %vm1673_vm12, %v3917_v55, %v3911_v40  ;;  %v1909_v40 = vadd.f32 %v3988_v36, %v3866_v0 }
0x132a   : > { %v714_v22 = vadd.f32 %v3203_v43, %v3460_v23  ;;  %v1920_v55 = vadd.f32 %v3868_v4, %v3988_v36  ;;  %v1949_v0 = vadd.f32 %v3882_v15, %v3988_v36  ;;  %v1952_v4 = vadd.f32 %v3886_v3, %v3988_v36 }
0x132b   : > { %v3935_v8 = vsel %vm1673_vm12, %v1661_v52, %v3829_v45  ;;  %v711_v45 = vadd.f32 %v3203_v43, %v3456_v21 }
0x132c   : > { %v1678_v59 = vpack.c.bf16 %v3935_v8, %v3931_v58 }
0x132e   : > { %1680 = vrot.lane.b32.xlu1 %v1678_v59, %s3256_s23 }
0x13a0   : > { %v1681_v60 = vpop.permute.xlu1 %1680 }
0x13a1   : > { %1684 = vst.msk [vmem:[#allocation3 + $0x30] sm:$0xff] %vm4342_vm0, %v1681_v60  ;;  %2889 = vmatmul.mubr.msk.bf16.vlgmr.msra.gmra.mrb[28].mxu1 %vm4342_vm0, %v1681_v60 }
0x13a8   : > { %v3942_v61 = vld [vmem:[#allocation3 + $0x30] sm:$0xff] }
0x13a9   : > { %2908 = vmatprep.mubr.msk.bf16.mxu0 %vm4342_vm0, %v3942_v61 }
0x1474   : > { %v1741_v62 = vpop.f32.mrb[28].mxu1 }
0x1475   : > { %v1748_v11 = vadd.f32 %v1741_v62, %v711_v45  ;;  %v2890_v6 = vpop.f32.mrb[29].mxu1  ;;  %v4001_v45 = vld [vmem:[%s4330_s7] ss:$0 sm:$0xff] }
0x1476   : > { %v1744_v18 = vpop.f32.mrb[30].mxu1 }
0x1477   : > { %3111 = vtanh.f32 %v1748_v11  ;;  %v1749_v20 = vadd.f32 %v1744_v18, %v714_v22  ;;  %v2891_v14 = vpop.f32.mrb[31].mxu1  ;;  %v2741_v28 = vmul.f32 -1.442695, %v1748_v11 }
0x1479   : > { %3113 = vtanh.f32 %v1749_v20  ;;  %v2742_v29 = vmul.f32 -1.442695, %v1749_v20 }
0x147a   : > { %3115 = vpow2.f32 %v2741_v28 }
0x147b   : > { %3117 = vpow2.f32 %v2742_v29 }
0x1481   : > { %v3112_v26 = vpop.eup %3111 }
0x1482   : > { %1768 = vrot.lane.b32.xlu0 %v3112_v26, %s3255_s26 }
0x1483   : > { %v3114_v17 = vpop.eup %3113 }
0x1484   : > { %1770 = vrot.lane.b32.xlu1 %v3114_v17, %s3255_s26  ;;  %v3116_v21 = vpop.eup %3115 }
0x1485   : > { %v3118_v23 = vpop.eup %3117  ;;  %v1756_v31 = vadd.f32 1.0, %v3116_v21 }
0x1486   : > { %v1757_v10 = vadd.f32 1.0, %v3118_v23 }
0x1487   : > { %3119 = vrcp.f32 %v1756_v31 }
0x1488   : > { %3121 = vrcp.f32 %v1757_v10 }
0x1491   : > { %v3953_v16 = vpop.eup %3119 }
0x1492   : > { %v3960_v39 = vpop.eup %3121  ;;  %v1764_v32 = vmul.f32 %v3953_v16, %v1676_v7 }
0x1493   : > { %v1765_v52 = vmul.f32 %v3960_v39, %v1677_v48 }
0x14f4   : > { %v1769_v33 = vpop.permute.xlu0 %1768 }
0x14f5   : > { %v1774_v19 = vmul.f32 %v3953_v16, %v1769_v33 }
0x14f6   : > { %v1771_v41 = vpop.permute.xlu1 %1770 }
0x14f7   : > { %1778 = vrot.lane.b32.xlu0 %v1774_v19, %s3255_s26  ;;  %v1775_v50 = vmul.f32 %v3960_v39, %v1771_v41 }
0x14f9   : > { %1780 = vrot.lane.b32.xlu1 %v1775_v50, %s3255_s26 }
0x14fb   : > { %1803 = vperm.xlu0 %2969, %v1800_v51  }
0x14fd   : > { %1806 = vperm.xlu1 %2970, %v1801_v30  }
0x1569   : > { %v1779_v44 = vpop.permute.xlu0 %1778 }
0x156a   : > { %v1784_v49 = vadd.f32 %v1779_v44, %v1764_v32  ;;  %v1917_v32 = vadd.f32 %v3864_v63, %v3988_v36  ;;  %v1925_v44 = vadd.f32 %v3988_v36, %v3876_v25  ;;  %v1944_v25 = vadd.f32 %v3988_v36, %v3888_v5 }
0x156b   : > { %v1781_v59 = vpop.permute.xlu1 %1780 }
0x156c   : > { %3123 = vtanh.f32 %v1784_v49  ;;  %v1785_v60 = vadd.f32 %v1781_v59, %v1765_v52 }
0x156e   : > { %3125 = vtanh.f32 %v1785_v60 }
0x156f   : > { %3127 = vtanh.f32 %v1909_v40 }
0x1570   : > { %3129 = vtanh.f32 %v1933_v42 }
0x1571   : > { %3131 = vtanh.f32 %v1920_v55 }
0x1572   : > { %3133 = vtanh.f32 %v1936_v37 }
0x1573   : > { %3135 = vtanh.f32 %v1949_v0 }
0x1574   : > { %3137 = vtanh.f32 %v1952_v4 }
0x1575   : > { %3139 = vtanh.f32 %v1917_v32 }
0x1576   : > { %v3124_v1 = vpop.eup %3123  ;;  %3141 = vtanh.f32 %v1925_v44 }
0x1577   : > { %1790 = vrot.lane.b32.xlu0 %v3124_v1, %s3255_s26 }
0x1578   : > { %v3126_v43 = vpop.eup %3125 }
0x1579   : > { %1792 = vrot.lane.b32.xlu1 %v3126_v43, %s3255_s26  ;;  %v3128_v38 = vpop.eup %3127  ;;  %s2464_s26 = scalar_lea.vmem (%p3370_p8), %s4374_s22, %s2763_s20 }
0x157a   : > { %v1994_v24 = vmul.f32 %v3128_v38, %v4001_v45  ;;  %v3130_v62 = vpop.eup %3129  ;;  %v1804_v31 = vpop.permute.xlu0 %1803 }
0x157b   : > { %v2000_v13 = vmul.f32 %v3130_v62, %v4001_v45  ;;  %v3132_v11 = vpop.eup %3131  ;;  %vm1808_vm5 = vcmp.eq.s32.totalorder %v1804_v31, 1 }
0x157c   : > { %v2010_v22 = vsel %vm4342_vm0, %v1994_v24, 0.0  ;;  %v1997_v18 = vmul.f32 %v3132_v11, %v4001_v45  ;;  %v3134_v20 = vpop.eup %3133  ;;  %v1807_v10 = vpop.permute.xlu1 %1806 }
0x157d   : > { %v2028_v6 = vsel %vm4342_vm0, %v2000_v13, 0.0  ;;  %v2001_v14 = vmul.f32 %v3134_v20, %v4001_v45  ;;  %v3136_v26 = vpop.eup %3135  ;;  %vm1809_vm12 = vcmp.eq.s32.totalorder %v1807_v10, 1 }
0x157e   : > { %v2019_v15 = vsel %vm4342_vm0, %v1997_v18, 0.0  ;;  %v2004_v17 = vmul.f32 %v3136_v26, %v4001_v45  ;;  %v3138_v28 = vpop.eup %3137 }
0x157f   : > { %v2031_v3 = vsel %vm4342_vm0, %v2001_v14, 0.0  ;;  %v2005_v21 = vmul.f32 %v3138_v28, %v4001_v45 }
0x1580   : > { %v2040_v29 = vsel %vm4342_vm0, %v2004_v17, 0.0 }
0x1581   : > { %v2043_v23 = vsel %vm4342_vm0, %v2005_v21, 0.0 }
0x159d   : > { %2011 = vadd.xlane.f32.xlu1 %v2010_v22 }
0x15a1   : > { %2029 = vadd.xlane.f32.xlu1 %v2028_v6 }
0x15a5   : > { %2020 = vadd.xlane.f32.xlu1 %v2019_v15 }
0x15a9   : > { %2032 = vadd.xlane.f32.xlu1 %v2031_v3 }
0x15ad   : > { %2041 = vadd.xlane.f32.xlu1 %v2040_v29 }
0x15b1   : > { %2044 = vadd.xlane.f32.xlu1 %v2043_v23 }
0x15e9   : > { %v1791_v33 = vpop.permute.xlu0 %1790 }
0x15ea   : > { %v1796_v19 = vmul.f32 %v3953_v16, %v1791_v33  ;;  %v1912_v16 = vadd.f32 %v3988_v36, %v3870_v9 }
0x15eb   : > { %v1793_v41 = vpop.permute.xlu1 %1792 }
0x15ec   : > { %v1797_v50 = vmul.f32 %v3960_v39, %v1793_v41  ;;  %v1810_v51 = vsel %vm1808_vm5, %v1796_v19, %v3931_v58  ;;  %3143 = vtanh.f32 %v1912_v16  ;;  %v1928_v58 = vadd.f32 %v3988_v36, %v3880_v2  ;;  %v3140_v39 = vpop.eup %3139 }
0x15ed   : > { %v1996_v48 = vmul.f32 %v3140_v39, %v4001_v45  ;;  %v3142_v63 = vpop.eup %3141  ;;  %vm2074_vm5 = vcmask 7168  }
0x15ee   : > { %v1811_v30 = vsel %vm1809_vm12, %v1797_v50, %v3935_v8  ;;  %3145 = vtanh.f32 %v1928_v58  ;;  %v1941_v8 = vadd.f32 %v3988_v36, %v3884_v12  ;;  %v1998_v9 = vmul.f32 %v3142_v63, %v4001_v45 }
0x15ef   : > { %v1812_v7 = vpack.c.bf16 %v1811_v30, %v1810_v51  ;;  %v2016_v49 = vsel %vm4342_vm0, %v1996_v48, 0.0  ;;  %vm4350_vm12 = vcmp.gt.s32.totalorder %v3490_v47, 4 }
0x15f0   : > { %3147 = vtanh.f32 %v1941_v8  ;;  %v2022_v2 = vsel %vm4342_vm0, %v1998_v9, 0.0 }
0x15f1   : > { %1814 = vrot.lane.b32.xlu0 %v1812_v7, %s3256_s23  ;;  %3149 = vtanh.f32 %v1944_v25  ;;  %s2678_s23 = sshll.u32 %s3399_s25, 7 }
0x15f2   : > { %s4205_s13 = scalar_lea.vmem [#allocation7], %s2678_s23 }
0x15f6   : > { %v3144_v52 = vpop.eup %3143 }
0x15f7   : > { %v1995_v59 = vmul.f32 %v3144_v52, %v4001_v45 }
0x15f8   : > { %v3146_v60 = vpop.eup %3145 }
0x15f9   : > { %v2013_v12 = vsel %vm4342_vm0, %v1995_v59, 0.0  ;;  %v1999_v1 = vmul.f32 %v3146_v60, %v4001_v45 }
0x15fa   : > { %v3148_v43 = vpop.eup %3147 }
0x15fb   : > { %v2025_v5 = vsel %vm4342_vm0, %v1999_v1, 0.0  ;;  %v2002_v40 = vmul.f32 %v3148_v43, %v4001_v45  ;;  %v3150_v42 = vpop.eup %3149 }
0x15fc   : > { %v2003_v37 = vmul.f32 %v3150_v42, %v4001_v45 }
0x15fd   : > { %v2034_v55 = vsel %vm4342_vm0, %v2002_v40, 0.0 }
0x15fe   : > { %v2037_v38 = vsel %vm4342_vm0, %v2003_v37, 0.0 }
0x1610   : > { %2017 = vadd.xlane.f32.xlu0 %v2016_v49 }
0x1614   : > { %2023 = vadd.xlane.f32.xlu0 %v2022_v2 }
0x1618   : > { %2014 = vadd.xlane.f32.xlu0 %v2013_v12 }
0x161c   : > { %2026 = vadd.xlane.f32.xlu0 %v2025_v5 }
0x1620   : > { %2035 = vadd.xlane.f32.xlu0 %v2034_v55 }
0x1624   : > { %2038 = vadd.xlane.f32.xlu0 %v2037_v38 }
0x162a   : > { %v2012_v33 = vpop.xlane.xlu1 %2011 }
0x162b   : > { %v2058_v48 = vsel %vm847_vm2, %v2012_v33, -1e+30 }
0x162c   : > { %v2075_v5 = vsel %vm2074_vm5, %v2058_v48, -inf }
0x162e   : > { %v2030_v41 = vpop.xlane.xlu1 %2029 }
0x162f   : > { %v4069_v58 = vsel %vm1254_vm14, %v2030_v41, -1e+30 }
0x1630   : > { %v2079_v25 = vsel %vm2074_vm5, %v4069_v58, -inf }
0x1632   : > { %v2021_v51 = vpop.xlane.xlu1 %2020 }
0x1633   : > { %v4084_v49 = vsel %vm983_vm7, %v2021_v51, -1e+30 }
0x1634   : > { %v2091_v40 = vsel %vm2074_vm5, %v4084_v49, -inf }
0x1636   : > { %v2033_v7 = vpop.xlane.xlu1 %2032 }
0x1637   : > { %v4078_v63 = vsel %vm1255_vm15, %v2033_v7, -1e+30 }
0x1638   : > { %v2094_v1 = vsel %vm2074_vm5, %v4078_v63, -inf }
0x163a   : > { %v2042_v44 = vpop.xlane.xlu1 %2041 }
0x163b   : > { %v2068_v2 = vsel %vm1526_vm1, %v2042_v44, -1e+30 }
0x163c   : > { %v2083_v37 = vsel %vm2074_vm5, %v2068_v2, -inf }
0x163e   : > { %v2045_v9 = vpop.xlane.xlu1 %2044 }
0x163f   : > { %v4102_v42 = vsel %vm1527_vm4, %v2045_v9, -1e+30 }
0x1663   : > { %v1815_v0 = vpop.permute.xlu0 %1814 }
0x1664   : > { %1818 = vst.msk [vmem:[#allocation3 + $0x38] sm:$0xff] %vm4342_vm0, %v1815_v0 }
0x166b   : > { %v4049_v24 = vld [vmem:[#allocation3 + $0x38] sm:$0xff] }
0x166c   : > { %2909 = vmatmul.mubr.msk.bf16.gmra.mrb[28].mxu0 %vm4342_vm0, %v4049_v24 }
0x169d   : > { %v2018_v19 = vpop.xlane.xlu0 %2017 }
0x169e   : > { %v2060_v16 = vsel %vm982_vm6, %v2018_v19, -1e+30 }
0x169f   : > { %v2076_v39 = vsel %vm2074_vm5, %v2060_v16, -inf }
0x16a0   : > { %v2080_v59 = vmax.f32 %v2076_v39, %v2079_v25 }
0x16a1   : > { %v2024_v50 = vpop.xlane.xlu0 %2023 }
0x16a2   : > { %v2062_v8 = vsel %vm1118_vm10, %v2024_v50, -1e+30 }
0x16a3   : > { %v2077_v60 = vsel %vm2074_vm5, %v2062_v8, -inf }
0x16a4   : > { %v2078_v38 = vmax.f32 %v2075_v5, %v2077_v60 }
0x16a5   : > { %v2015_v30 = vpop.xlane.xlu0 %2014 }
0x16a6   : > { %v2059_v0 = vsel %vm848_vm3, %v2015_v30, -1e+30 }
0x16a9   : > { %v2027_v32 = vpop.xlane.xlu0 %2026 }
0x16aa   : > { %v4095_v43 = vsel %vm1119_vm11, %v2027_v32, -1e+30 }
0x173f   : > { %v2910_v62 = vpop.f32.mrb[28].mxu0 }
0x1740   : > { %v1965_v4 = vadd.f32 %v2910_v62, %v3988_v36  ;;  %v1956_v22 = vpop.f32.mrb[29].mxu0 }
0x1741   : > { %v1957_v13 = vadd.f32 %v3988_v36, %v1956_v22  ;;  %v2911_v11 = vpop.f32.mrb[30].mxu0  ;;  %v2095_v22 = vmax.f32 %v2091_v40, %v2094_v1 }
0x1742   : > { %3151 = vtanh.f32 %v1965_v4  ;;  %v1968_v6 = vadd.f32 %v2911_v11, %v3988_v36  ;;  %v1959_v18 = vpop.f32.mrb[31].mxu0  ;;  %v2084_v11 = vmax.f32 %v2080_v59, %v2083_v37 }
0x1743   : > { %3153 = vtanh.f32 %v1957_v13  ;;  %v1960_v20 = vadd.f32 %v3988_v36, %v1959_v18  ;;  %v2092_v13 = vsel %vm2074_vm5, %v4095_v43, -inf }
0x1744   : > { %3155 = vtanh.f32 %v1968_v6 }
0x1745   : > { %3157 = vtanh.f32 %v1960_v20  ;;  %v2098_v20 = vsel %vm2074_vm5, %v4102_v42, -inf }
0x174c   : > { %v3152_v15 = vpop.eup %3151 }
0x174d   : > { %v3154_v14 = vpop.eup %3153  ;;  %v2008_v26 = vmul.f32 %v3152_v15, %v4001_v45 }
0x174e   : > { %v3156_v3 = vpop.eup %3155  ;;  %v2006_v17 = vmul.f32 %v3154_v14, %v4001_v45 }
0x174f   : > { %v3158_v28 = vpop.eup %3157  ;;  %v2052_v29 = vsel %vm4342_vm0, %v2008_v26, 0.0  ;;  %v2009_v21 = vmul.f32 %v3156_v3, %v4001_v45  ;;  %v2090_v3 = vsel %vm2074_vm5, %v2059_v0, -inf }
0x1750   : > { %2053 = vadd.xlane.f32.xlu1 %v2052_v29  ;;  %v2046_v23 = vsel %vm4342_vm0, %v2006_v17, 0.0  ;;  %v2007_v31 = vmul.f32 %v3158_v28, %v4001_v45  ;;  %v2036_v45 = vpop.xlane.xlu0 %2035 }
0x1751   : > { %2047 = vadd.xlane.f32.xlu0 %v2046_v23  ;;  %v2055_v36 = vsel %vm4342_vm0, %v2009_v21, 0.0  ;;  %v2066_v52 = vsel %vm1390_vm8, %v2036_v45, -1e+30  ;;  %v2093_v21 = vmax.f32 %v2090_v3, %v2092_v13 }
0x1752   : > { %v2049_v10 = vsel %vm4342_vm0, %v2007_v31, 0.0  ;;  %v2081_v55 = vsel %vm2074_vm5, %v2066_v52, -inf  ;;  %vm4351_vm0 = vcmp.gt.s32.totalorder %v3481_v35, 6 }
0x1753   : > { %v2082_v15 = vmax.f32 %v2078_v38, %v2081_v55 }
0x1754   : > { %2056 = vadd.xlane.f32.xlu1 %v2055_v36  ;;  %v2039_v12 = vpop.xlane.xlu0 %2038  ;;  %v2099_v36 = vmax.f32 %v2095_v22, %v2098_v20 }
0x1755   : > { %2050 = vadd.xlane.f32.xlu0 %v2049_v10  ;;  %v4110_v62 = vsel %vm4350_vm12, %v2039_v12, -1e+30 }
0x1756   : > { %v2096_v17 = vsel %vm2074_vm5, %v4110_v62, -inf }
0x1757   : > { %v2097_v19 = vmax.f32 %v2093_v21, %v2096_v17 }
0x17dd   : > { %v2054_v4 = vpop.xlane.xlu1 %2053 }
0x17de   : > { %v2072_v6 = vsel %vm1798_vm9, %v2054_v4, -1e+30  ;;  %v2048_v18 = vpop.xlane.xlu0 %2047 }
0x17df   : > { %v2087_v14 = vsel %vm2074_vm5, %v2072_v6, -inf  ;;  %v2070_v26 = vsel %vm4351_vm0, %v2048_v18, -1e+30  ;;  %vm4352_vm0 = vcmp.gt.s32.totalorder %v3490_v47, 6 }
0x17e0   : > { %v2088_v28 = vmax.f32 %v2084_v11, %v2087_v14  ;;  %v2085_v29 = vsel %vm2074_vm5, %v2070_v26, -inf }
0x17e1   : > { %v2086_v23 = vmax.f32 %v2082_v15, %v2085_v29  ;;  %v2057_v31 = vpop.xlane.xlu1 %2056 }
0x17e2   : > { %v4127_v10 = vsel %vm1799_vm13, %v2057_v31, -1e+30  ;;  %v2051_v33 = vpop.xlane.xlu0 %2050 }
0x17e3   : > { %v2089_v41 = vmax.f32 %v2086_v23, %v2088_v28  ;;  %v2102_v50 = vsel %vm2074_vm5, %v4127_v10, -inf  ;;  %v2071_v51 = vsel %vm4352_vm0, %v2051_v33, -1e+30 }
0x17e4   : > { %v2103_v30 = vmax.f32 %v2099_v36, %v2102_v50  ;;  %v2100_v7 = vsel %vm2074_vm5, %v2071_v51, -inf }
0x17e5   : > { %v2117_v32 = vsub.f32 %v2070_v26, %v2089_v41  ;;  %v2101_v44 = vmax.f32 %v2097_v19, %v2100_v7  ;;  %v2105_v45 = vsub.f32 %v2058_v48, %v2089_v41  ;;  %v2107_v39 = vsub.f32 %v2060_v16, %v2089_v41 }
0x17e6   : > { %v2109_v25 = vsub.f32 %v2062_v8, %v2089_v41  ;;  %v2111_v9 = vsub.f32 %v4069_v58, %v2089_v41  ;;  %v2113_v60 = vsub.f32 %v2066_v52, %v2089_v41  ;;  %v2115_v1 = vsub.f32 %v2068_v2, %v2089_v41 }
0x17e7   : > { %v2104_v59 = vmax.f32 %v2101_v44, %v2103_v30  ;;  %v2121_v12 = vmul.f32 1.442695, %v2105_v45  ;;  %v2125_v5 = vmul.f32 1.442695, %v2107_v39  ;;  %v2145_v55 = vmul.f32 1.442695, %v2117_v32 }
0x17e8   : > { %v2129_v40 = vmul.f32 1.442695, %v2109_v25  ;;  %v2119_v37 = vsub.f32 %v2072_v6, %v2089_v41  ;;  %v2133_v38 = vmul.f32 1.442695, %v2111_v9  ;;  %v2137_v22 = vmul.f32 1.442695, %v2113_v60 }
0x17e9   : > { %3159 = vpow2.f32 %v2121_v12  ;;  %v2106_v4 = vsub.f32 %v2059_v0, %v2104_v59  ;;  %v2108_v13 = vsub.f32 %v4084_v49, %v2104_v59  ;;  %v2141_v16 = vmul.f32 1.442695, %v2115_v1 }
0x17ea   : > { %3161 = vpow2.f32 %v2125_v5  ;;  %v2110_v8 = vsub.f32 %v4095_v43, %v2104_v59  ;;  %v2149_v58 = vmul.f32 1.442695, %v2119_v37  ;;  %v2112_v48 = vsub.f32 %v4078_v63, %v2104_v59 }
0x17eb   : > { %3163 = vpow2.f32 %v2129_v40  ;;  %v2114_v52 = vsub.f32 %v4110_v62, %v2104_v59  ;;  %v2123_v2 = vmul.f32 1.442695, %v2106_v4  ;;  %v2116_v11 = vsub.f32 %v4102_v42, %v2104_v59 }
0x17ec   : > { %3165 = vpow2.f32 %v2145_v55  ;;  %v2127_v0 = vmul.f32 1.442695, %v2108_v13  ;;  %v2131_v6 = vmul.f32 1.442695, %v2110_v8  ;;  %v2118_v18 = vsub.f32 %v2071_v51, %v2104_v59 }
0x17ed   : > { %3167 = vpow2.f32 %v2133_v38  ;;  %v2135_v49 = vmul.f32 1.442695, %v2112_v48  ;;  %v2139_v20 = vmul.f32 1.442695, %v2114_v52  ;;  %v2120_v43 = vsub.f32 %v4127_v10, %v2104_v59 }
0x17ee   : > { %3169 = vpow2.f32 %v2137_v22  ;;  %v2143_v15 = vmul.f32 1.442695, %v2116_v11  ;;  %v2147_v62 = vmul.f32 1.442695, %v2118_v18 }
0x17ef   : > { %3171 = vpow2.f32 %v2141_v16  ;;  %v2151_v23 = vmul.f32 1.442695, %v2120_v43 }
0x17f0   : > { %3173 = vpow2.f32 %v2149_v58 }
0x17f1   : > { %3175 = vpow2.f32 %v2123_v2 }
0x17f2   : > { %3177 = vpow2.f32 %v2127_v0 }
0x17f3   : > { %v3160_v63 = vpop.eup %3159  ;;  %3179 = vpow2.f32 %v2131_v6 }
0x17f4   : > { %v3162_v14 = vpop.eup %3161  ;;  %v4143_v26 = vsel %vm847_vm2, %v3160_v63, 0.0  ;;  %3181 = vpow2.f32 %v2135_v49  ;;  %vm4353_vm2 = vcmp.gt.s32.totalorder %v3481_v35, 6 }
0x17f5   : > { %v3164_v42 = vpop.eup %3163  ;;  %v4147_v3 = vsel %vm982_vm6, %v3162_v14, 0.0  ;;  %v2169_v17 = vsel %vm2074_vm5, %v4143_v26, 0.0  ;;  %3183 = vpow2.f32 %v2139_v20  ;;  %vm4355_vm6 = vmmov %vm4352_vm0 }
0x17f6   : > { %v3166_v28 = vpop.eup %3165  ;;  %v4153_v29 = vsel %vm1118_vm10, %v3164_v42, 0.0  ;;  %v2170_v21 = vsel %vm2074_vm5, %v4147_v3, 0.0  ;;  %3185 = vpow2.f32 %v2143_v15 }
0x17f7   : > { %v3168_v31 = vpop.eup %3167  ;;  %v2171_v36 = vadd.f32 %v2170_v21, %v2169_v17  ;;  %3187 = vpow2.f32 %v2147_v62  ;;  %v2172_v19 = vsel %vm2074_vm5, %v4153_v29, 0.0  ;;  %v2165_v60 = vsel %vm4353_vm2, %v3166_v28, 0.0 }
0x17f8   : > { %v3170_v10 = vpop.eup %3169  ;;  %v2159_v33 = vsel %vm1254_vm14, %v3168_v31, 0.0  ;;  %3189 = vpow2.f32 %v2151_v23  ;;  %v2180_v58 = vsel %vm2074_vm5, %v2165_v60, 0.0 }
0x17f9   : > { %v3172_v41 = vpop.eup %3171  ;;  %v2161_v50 = vsel %vm1390_vm8, %v3170_v10, 0.0  ;;  %v2173_v51 = vadd.f32 %v2172_v19, %v2171_v36  ;;  %v2174_v7 = vsel %vm2074_vm5, %v2159_v33, 0.0 }
0x17fa   : > { %v3174_v30 = vpop.eup %3173  ;;  %v2163_v44 = vsel %vm1526_vm1, %v3172_v41, 0.0  ;;  %v2176_v25 = vsel %vm2074_vm5, %v2161_v50, 0.0 }
0x17fb   : > { %v3176_v32 = vpop.eup %3175  ;;  %v2175_v45 = vadd.f32 %v2174_v7, %v2173_v51  ;;  %v2178_v55 = vsel %vm2074_vm5, %v2163_v44, 0.0  ;;  %v2167_v35 = vsel %vm1798_vm9, %v3174_v30, 0.0 }
0x17fc   : > { %v3178_v39 = vpop.eup %3177  ;;  %v4169_v9 = vsel %vm848_vm3, %v3176_v32, 0.0  ;;  %vm4354_vm3 = vmmov %vm4350_vm12  ;;  %v2182_v6 = vsel %vm2074_vm5, %v2167_v35, 0.0 }
0x17fd   : > { %v3180_v59 = vpop.eup %3179  ;;  %v2177_v12 = vadd.f32 %v2176_v25, %v2175_v45  ;;  %v2156_v1 = vsel %vm983_vm7, %v3178_v39, 0.0  ;;  %v2184_v5 = vsel %vm2074_vm5, %v4169_v9, 0.0  ;;  %vm4356_vm7 = vcmask 261120  }
0x17fe   : > { %v3182_v40 = vpop.eup %3181  ;;  %v2158_v37 = vsel %vm1119_vm11, %v3180_v59, 0.0  ;;  %v2185_v38 = vsel %vm2074_vm5, %v2156_v1, 0.0  ;;  %vm4357_vm10 = vmmov %vm4356_vm7 }
0x17ff   : > { %v3184_v4 = vpop.eup %3183  ;;  %v2179_v22 = vadd.f32 %v2178_v55, %v2177_v12  ;;  %v2160_v13 = vsel %vm1255_vm15, %v3182_v40, 0.0  ;;  %v2186_v16 = vadd.f32 %v2185_v38, %v2184_v5  ;;  %v2187_v48 = vsel %vm2074_vm5, %v2158_v37, 0.0  ;;  %vm4358_vm11 = vmmov %vm4356_vm7 }
0x1800   : > { %v3186_v8 = vpop.eup %3185  ;;  %v2162_v2 = vsel %vm4354_vm3, %v3184_v4, 0.0  ;;  %v2189_v34 = vsel %vm2074_vm5, %v2160_v13, 0.0  ;;  %v2243_v40 = vunpack.c.l.bf16 %v3839_v46  ;;  %v2245_v55 = vunpack.c.l.bf16 %v3843_v53  ;;  %vm4359_vm14 = vmmov %vm4356_vm7 }
0x1801   : > { %v2181_v52 = vadd.f32 %v2180_v58, %v2179_v22  ;;  %v2188_v11 = vadd.f32 %v2187_v48, %v2186_v16  ;;  %v3188_v0 = vpop.eup %3187  ;;  %v2164_v49 = vsel %vm1527_vm4, %v3186_v8, 0.0  ;;  %v2191_v15 = vsel %vm2074_vm5, %v2162_v2, 0.0  ;;  %vm4360_vm15 = vmmov %vm4356_vm7 }
0x1802   : > { %v3190_v43 = vpop.eup %3189  ;;  %v2166_v63 = vsel %vm4355_vm6, %v3188_v0, 0.0  ;;  %v2193_v42 = vsel %vm2074_vm5, %v2164_v49, 0.0  ;;  %v2247_v4 = vunpack.c.l.bf16 %v3847_v54  ;;  %v2249_v8 = vunpack.c.l.bf16 %v3851_v56  ;;  %vm4361_vm8 = vmmov %vm4356_vm7 }
0x1803   : > { %v2183_v18 = vadd.f32 %v2182_v6, %v2181_v52  ;;  %v2190_v20 = vadd.f32 %v2189_v34, %v2188_v11  ;;  %v2168_v17 = vsel %vm1799_vm13, %v3190_v43, 0.0  ;;  %v2195_v21 = vsel %vm2074_vm5, %v2166_v63, 0.0  ;;  %v3206_v52 = vld [vmem:[#allocation3] sm:$0xff]  ;;  %v3207_v34 = vld [vmem:[#allocation3 + $0x18] sm:$0xff]  ;;  %vm4362_vm9 = vmmov %vm4356_vm7 }
0x1804   : > { %v2197_v31 = vsel %vm2074_vm5, %v2168_v17, 0.0  ;;  %v2248_v58 = vunpack.c.h.bf16 %v3847_v54  ;;  %v2251_v48 = vunpack.c.l.bf16 %v3855_v57  ;;  %vm4363_vm1 = vmmov %vm4356_vm7 }
0x1805   : > { %v2199_v14 = vmax.f32 %v2183_v18, 1e-30  ;;  %v2192_v62 = vadd.f32 %v2191_v15, %v2190_v20  ;;  %v2250_v18 = vunpack.c.h.bf16 %v3207_v34  ;;  %vm4364_vm4 = vmmov %vm4363_vm1  ;;  %v2756_v34 = vld [vmem:[#allocation4] ss:$0 sm:$0xff] }
0x1806   : > { %vm4365_vm13 = vmmov %vm4363_vm1 }
0x1807   : > { %3191 = vrcp.f32 %v2199_v14  ;;  %v2194_v28 = vadd.f32 %v2193_v42, %v2192_v62  ;;  %v3209_v14 = vld [vmem:[#allocation3 + $0x28] sm:$0xff]  ;;  %vm4366_vm12 = vmmov %vm4363_vm1 }
0x1808   : > { %v2253_v62 = vunpack.c.l.bf16 %v3209_v14  ;;  %vm4367_vm0 = vmmov %vm4363_vm1 }
0x1809   : > { %v2196_v23 = vadd.f32 %v2195_v21, %v2194_v28  ;;  %vm4368_vm2 = vmmov %vm4367_vm0 }
0x180a   : > { %vm4369_vm3 = vmmov %vm4367_vm0 }
0x180b   : > { %v2198_v36 = vadd.f32 %v2197_v31, %v2196_v23  ;;  %vm4370_vm6 = vmmov %vm4367_vm0 }
0x180d   : > { %v2200_v10 = vmax.f32 %v2198_v36, 1e-30 }
0x180f   : > { %3193 = vrcp.f32 %v2200_v10 }
0x1811   : > { %v3192_v47 = vpop.eup %3191 }
0x1812   : > { %v2205_v19 = vmul.f32 %v3192_v47, %v4147_v3  ;;  %v2202_v41 = vmul.f32 %v3192_v47, %v4143_v26  ;;  %v2207_v51 = vmul.f32 %v3192_v47, %v4153_v29  ;;  %v2209_v30 = vmul.f32 %v3192_v47, %v2159_v33 }
0x1813   : > { %v2211_v27 = vmul.f32 %v3192_v47, %v2161_v50  ;;  %v2213_v7 = vmul.f32 %v3192_v47, %v2163_v44  ;;  %v2215_v32 = vmul.f32 %v3192_v47, %v2165_v60  ;;  %v2217_v45 = vmul.f32 %v3192_v47, %v2167_v35 }
0x1814   : > { %2271 = vperm.xlu1 %2970, %v2205_v19   ;;  %2221 = vst.msk [vmem:[%s4205_s13 + $0x10] sm:$0xff] %vm2074_vm5, %v2205_v19  ;;  %2261 = vperm.xlu0 %2969, %v2202_v41   ;;  %2219 = vst.msk [vmem:[%s4205_s13] sm:$0xff] %vm2074_vm5, %v2202_v41 }
0x1815   : > { %2223 = vst.msk [vmem:[%s4205_s13 + $0x20] sm:$0xff] %vm2074_vm5, %v2207_v51  ;;  %2225 = vst.msk [vmem:[%s4205_s13 + $0x30] sm:$0xff] %vm2074_vm5, %v2209_v30 }
0x1816   : > { %2227 = vst.msk [vmem:[%s4205_s13 + $0x40] sm:$0xff] %vm2074_vm5, %v2211_v27  ;;  %2229 = vst.msk [vmem:[%s4205_s13 + $0x50] sm:$0xff] %vm2074_vm5, %v2213_v7 }
0x1817   : > { %2231 = vst.msk [vmem:[%s4205_s13 + $0x60] sm:$0xff] %vm2074_vm5, %v2215_v32  ;;  %2233 = vst.msk [vmem:[%s4205_s13 + $0x70] sm:$0xff] %vm2074_vm5, %v2217_v45 }
0x1818   : > { %2281 = vperm.xlu1 %2970, %v2207_v51  }
0x1819   : > { %v3194_v26 = vpop.eup %3193 }
0x181a   : > { %v2206_v3 = vmul.f32 %v3194_v26, %v2156_v1  ;;  %v2208_v29 = vmul.f32 %v3194_v26, %v2158_v37  ;;  %v2210_v33 = vmul.f32 %v3194_v26, %v2160_v13  ;;  %v2212_v50 = vmul.f32 %v3194_v26, %v2162_v2 }
0x181b   : > { %v2204_v44 = vmul.f32 %v3194_v26, %v4169_v9  ;;  %v2214_v39 = vmul.f32 %v3194_v26, %v2164_v49  ;;  %v2216_v25 = vmul.f32 %v3194_v26, %v2166_v63  ;;  %v2218_v59 = vmul.f32 %v3194_v26, %v2168_v17  ;;  %v3208_v63 = vld [vmem:[#allocation3 + $0x20] sm:$0xff] }
0x181c   : > { %2276 = vperm.xlu0 %2969, %v2206_v3   ;;  %2222 = vst.msk [vmem:[%s4205_s13 + $0x18] sm:$0xff] %vm2074_vm5, %v2206_v3  ;;  %2291 = vperm.xlu1 %2970, %v2209_v30   ;;  %2224 = vst.msk [vmem:[%s4205_s13 + $0x28] sm:$0xff] %vm2074_vm5, %v2208_v29  ;;  %v2246_v13 = vunpack.c.h.bf16 %v3843_v53  ;;  %v2244_v2 = vunpack.c.h.bf16 %v3206_v52  ;;  %v2252_v57 = vunpack.c.h.bf16 %v3208_v63  ;;  %v2255_v26 = vunpack.c.l.bf16 %v3942_v61 }
0x181d   : > { %2226 = vst.msk [vmem:[%s4205_s13 + $0x38] sm:$0xff] %vm2074_vm5, %v2210_v33  ;;  %2228 = vst.msk [vmem:[%s4205_s13 + $0x48] sm:$0xff] %vm2074_vm5, %v2212_v50 }
0x181e   : > { %2220 = vst.msk [vmem:[%s4205_s13 + $0x8] sm:$0xff] %vm2074_vm5, %v2204_v44  ;;  %2230 = vst.msk [vmem:[%s4205_s13 + $0x58] sm:$0xff] %vm2074_vm5, %v2214_v39 }
0x181f   : > { %2232 = vst.msk [vmem:[%s4205_s13 + $0x68] sm:$0xff] %vm2074_vm5, %v2216_v25  ;;  %2234 = vst.msk [vmem:[%s4205_s13 + $0x78] sm:$0xff] %vm2074_vm5, %v2218_v59 }
0x1820   : > { %2286 = vperm.xlu0 %2969, %v2208_v29   ;;  %2301 = vperm.xlu1 %2970, %v2211_v27  }
0x1824   : > { %2296 = vperm.xlu0 %2969, %v2210_v33   ;;  %2266 = vperm.xlu1 %2970, %v2204_v44  }
0x1828   : > { %2306 = vperm.xlu0 %2969, %v2212_v50   ;;  %2311 = vperm.xlu1 %2970, %v2213_v7  }
0x182c   : > { %2316 = vperm.xlu0 %2969, %v2214_v39   ;;  %2321 = vperm.xlu1 %2970, %v2215_v32   ;;  %v2254_v32 = vunpack.c.h.bf16 %v3209_v14 }
0x1830   : > { %2326 = vperm.xlu0 %2969, %v2216_v25   ;;  %2331 = vperm.xlu1 %2970, %v2217_v45  }
0x1834   : > { %2336 = vperm.xlu0 %2969, %v2218_v59  }
0x1893   : > { %v2272_v9 = vpop.permute.xlu1 %2271  ;;  %v2262_v60 = vpop.permute.xlu0 %2261 }
0x1894   : > { %v2339_v37 = vmul.f32 %v2262_v60, %v2243_v40  ;;  %v2341_v38 = vmul.f32 %v2272_v9, %v2245_v55 }
0x1896   : > { %v2355_v46 = vsel %vm4356_vm7, %v2339_v37, 0.0  ;;  %v2356_v11 = vsel %vm4357_vm10, %v2341_v38, 0.0  ;;  %vm4371_vm7 = vmmov %vm4367_vm0 }
0x1897   : > { %v2282_v12 = vpop.permute.xlu1 %2281  ;;  %v2357_v54 = vadd.f32 %v2356_v11, %v2355_v46  ;;  %vm4372_vm10 = vmmov %vm4367_vm0 }
0x1898   : > { %v2343_v16 = vmul.f32 %v2282_v12, %v2247_v4  ;;  %v2256_v12 = vunpack.c.h.bf16 %v3942_v61  ;;  %v2755_v61 = vld [vmem:[%s4331_s8] ss:$0 sm:$0xff] }
0x189a   : > { %v2358_v53 = vsel %vm4358_vm11, %v2343_v16, 0.0  ;;  %vm4373_vm11 = vmmov %vm4367_vm0 }
0x189b   : > { %v2277_v1 = vpop.permute.xlu0 %2276  ;;  %v2292_v5 = vpop.permute.xlu1 %2291  ;;  %v2359_v23 = vadd.f32 %v2358_v53, %v2357_v54 }
0x189c   : > { %v2342_v0 = vmul.f32 %v2277_v1, %v2246_v13  ;;  %v2345_v6 = vmul.f32 %v2292_v5, %v2249_v8  ;;  %v2257_v5 = vunpack.c.l.bf16 %v4049_v24  ;;  %v2258_v13 = vunpack.c.h.bf16 %v4049_v24 }
0x189e   : > { %v2371_v42 = vsel %vm4359_vm14, %v2342_v0, 0.0  ;;  %v2360_v17 = vsel %vm4360_vm15, %v2345_v6, 0.0 }
0x189f   : > { %v2287_v35 = vpop.permute.xlu0 %2286  ;;  %v2302_v22 = vpop.permute.xlu1 %2301  ;;  %v2361_v30 = vadd.f32 %v2360_v17, %v2359_v23 }
0x18a0   : > { %v2344_v43 = vmul.f32 %v2287_v35, %v2248_v58  ;;  %v2347_v56 = vmul.f32 %v2302_v22, %v2251_v48 }
0x18a2   : > { %v2373_v47 = vsel %vm4362_vm9, %v2344_v43, 0.0  ;;  %v2362_v19 = vsel %vm4363_vm1, %v2347_v56, 0.0 }
0x18a3   : > { %v2297_v49 = vpop.permute.xlu0 %2296  ;;  %v2267_v20 = vpop.permute.xlu1 %2266  ;;  %v2363_v3 = vadd.f32 %v2362_v19, %v2361_v30 }
0x18a4   : > { %v2340_v15 = vmul.f32 %v2267_v20, %v2244_v2  ;;  %v2346_v28 = vmul.f32 %v2297_v49, %v2250_v18 }
0x18a6   : > { %v2370_v21 = vsel %vm4361_vm8, %v2340_v15, 0.0  ;;  %v2375_v7 = vsel %vm4364_vm4, %v2346_v28, 0.0  ;;  %v2409_v28 = vld [vmem:[%s506_s18] sm:$0xff] }
0x18a7   : > { %v2307_v31 = vpop.permute.xlu0 %2306  ;;  %v2372_v36 = vadd.f32 %v2371_v42, %v2370_v21  ;;  %v2312_v10 = vpop.permute.xlu1 %2311 }
0x18a8   : > { %v2348_v41 = vmul.f32 %v2307_v31, %v2252_v57  ;;  %v2349_v51 = vmul.f32 %v2312_v10, %v2253_v62  ;;  %v2410_v31 = vld [vmem:[%s506_s18 + $0x8] sm:$0xff] }
0x18a9   : > { %v2374_v27 = vadd.f32 %v2373_v47, %v2372_v36 }
0x18aa   : > { %v2364_v45 = vsel %vm4365_vm13, %v2349_v51, 0.0  ;;  %v2377_v44 = vsel %vm4366_vm12, %v2348_v41, 0.0 }
0x18ab   : > { %v2317_v29 = vpop.permute.xlu0 %2316  ;;  %v2376_v33 = vadd.f32 %v2375_v7, %v2374_v27  ;;  %v2322_v50 = vpop.permute.xlu1 %2321  ;;  %v2365_v9 = vadd.f32 %v2364_v45, %v2363_v3  ;;  %v2522_v3 = vld [vmem:[%s4205_s13] sm:$0xff] (%p3370_p8) }
0x18ac   : > { %v2350_v39 = vmul.f32 %v2317_v29, %v2254_v32  ;;  %v2351_v25 = vmul.f32 %v2322_v50, %v2255_v26  ;;  %v2524_v29 = vld [vmem:[%s4205_s13 + $0x8] sm:$0xff] (%p3370_p8)  ;;  %v2528_v50 = vld [vmem:[%s4205_s13 + $0x18] sm:$0xff] (%p3370_p8)  ;;  %2523 = vst [vmem:[%s2464_s26] sm:$0xff] (%p3370_p8), %v2522_v3 }
0x18ad   : > { %v2378_v59 = vadd.f32 %v2377_v44, %v2376_v33  ;;  %v2526_v33 = vld [vmem:[%s4205_s13 + $0x10] sm:$0xff] (%p3370_p8)  ;;  %v2530_v44 = vld [vmem:[%s4205_s13 + $0x20] sm:$0xff] (%p3370_p8)  ;;  %2525 = vst [vmem:[%s2464_s26 + $0x8] sm:$0xff] (%p3370_p8), %v2524_v29  ;;  %2529 = vst [vmem:[%s2464_s26 + $0x28] sm:$0xff] (%p3370_p8), %v2528_v50 }
0x18ae   : > { %v2379_v60 = vsel %vm4367_vm0, %v2350_v39, 0.0  ;;  %v2366_v1 = vsel %vm4368_vm2, %v2351_v25, 0.0  ;;  %v2532_v39 = vld [vmem:[%s4205_s13 + $0x28] sm:$0xff] (%p3370_p8)  ;;  %2527 = vst [vmem:[%s2464_s26 + $0x20] sm:$0xff] (%p3370_p8), %v2526_v33  ;;  %2531 = vst [vmem:[%s2464_s26 + $0x40] sm:$0xff] (%p3370_p8), %v2530_v44  ;;  %v2534_v25 = vld [vmem:[%s4205_s13 + $0x30] sm:$0xff] (%p3370_p8) }
0x18af   : > { %v2380_v40 = vadd.f32 %v2379_v60, %v2378_v59  ;;  %v2327_v55 = vpop.permute.xlu0 %2326  ;;  %v2367_v37 = vadd.f32 %v2366_v1, %v2365_v9  ;;  %v2332_v38 = vpop.permute.xlu1 %2331  ;;  %2533 = vst [vmem:[%s2464_s26 + $0x48] sm:$0xff] (%p3370_p8), %v2532_v39  ;;  %v2536_v59 = vld [vmem:[%s4205_s13 + $0x38] sm:$0xff] (%p3370_p8)  ;;  %v2538_v9 = vld [vmem:[%s4205_s13 + $0x40] sm:$0xff] (%p3370_p8)  ;;  %2535 = vst [vmem:[%s2464_s26 + $0x60] sm:$0xff] (%p3370_p8), %v2534_v25 }
0x18b0   : > { %v2352_v4 = vmul.f32 %v2327_v55, %v2256_v12  ;;  %v2353_v35 = vmul.f32 %v2332_v38, %v2257_v5  ;;  %2537 = vst [vmem:[%s2464_s26 + $0x68] sm:$0xff] (%p3370_p8), %v2536_v59  ;;  %2539 = vst [vmem:[%s2464_s26 + $0x80] sm:$0xff] (%p3370_p8), %v2538_v9  ;;  %v2540_v60 = vld [vmem:[%s4205_s13 + $0x48] sm:$0xff] (%p3370_p8)  ;;  %v2542_v12 = vld [vmem:[%s4205_s13 + $0x50] sm:$0xff] (%p3370_p8) }
0x18b1   : > { %v2544_v1 = vld [vmem:[%s4205_s13 + $0x58] sm:$0xff] (%p3370_p8)  ;;  %2541 = vst [vmem:[%s2464_s26 + $0x88] sm:$0xff] (%p3370_p8), %v2540_v60  ;;  %2543 = vst [vmem:[%s2464_s26 + $0xa0] sm:$0xff] (%p3370_p8), %v2542_v12  ;;  %v2546_v5 = vld [vmem:[%s4205_s13 + $0x60] sm:$0xff] (%p3370_p8) }
0x18b2   : > { %v2381_v22 = vsel %vm4369_vm3, %v2352_v4, 0.0  ;;  %v2368_v16 = vsel %vm4370_vm6, %v2353_v35, 0.0  ;;  %2545 = vst [vmem:[%s2464_s26 + $0xa8] sm:$0xff] (%p3370_p8), %v2544_v1  ;;  %v2550_v55 = vld [vmem:[%s4205_s13 + $0x70] sm:$0xff] (%p3370_p8)  ;;  %2547 = vst [vmem:[%s2464_s26 + $0xc0] sm:$0xff] (%p3370_p8), %v2546_v5 }
0x18b3   : > { %v2382_v8 = vadd.f32 %v2381_v22, %v2380_v40  ;;  %v2337_v58 = vpop.permute.xlu0 %2336  ;;  %v2369_v48 = vadd.f32 %v2368_v16, %v2367_v37  ;;  %v2548_v40 = vld [vmem:[%s4205_s13 + $0x68] sm:$0xff] (%p3370_p8)  ;;  %2551 = vst [vmem:[%s2464_s26 + $0xe0] sm:$0xff] (%p3370_p8), %v2550_v55  ;;  %v2552_v37 = vld [vmem:[%s4205_s13 + $0x78] sm:$0xff] (%p3370_p8) }
0x18b4   : > { %v2354_v52 = vmul.f32 %v2337_v58, %v2258_v13  ;;  %2549 = vst [vmem:[%s2464_s26 + $0xc8] sm:$0xff] (%p3370_p8), %v2548_v40  ;;  %2553 = vst [vmem:[%s2464_s26 + $0xe8] sm:$0xff] (%p3370_p8), %v2552_v37 }
0x18b5   : > { %v2392_v2 = vmul.f32 %v2755_v61, %v2369_v48 }
0x18b6   : > { %v2383_v46 = vsel %vm4371_vm7, %v2354_v52, 0.0 }
0x18b7   : > { %v2384_v11 = vadd.f32 %v2383_v46, %v2382_v8  ;;  %v2394_v0 = vsel %vm4372_vm10, %v2392_v2, 0.0 }
0x18b8   : > { %2395 = vadd.xlane.f32.xlu1 %v2394_v0 }
0x18b9   : > { %v2393_v6 = vmul.f32 %v2755_v61, %v2384_v11 }
0x18bb   : > { %v2397_v24 = vsel %vm4373_vm11, %v2393_v6, 0.0 }
0x18bc   : > { %2398 = vadd.xlane.f32.xlu0 %v2397_v24 }
0x1945   : > { %v2396_v18 = vpop.xlane.xlu1 %2395 }
0x1946   : > { %v2407_v49 = vadd.f32 %v2756_v34, %v2396_v18 }
0x1948   : > { %v2417_v20 = vand.u32 2147483647, %v2407_v49  ;;  %2433 = vst.msk [vmem:[%s4276_s28] sm:$0xff] %vm2074_vm5, %v2407_v49  ;;  %v2411_v21 = vmax.f32 %v2407_v49, 0.0  ;;  %v2413_v23 = vmul.f32 %v2409_v28, %v2407_v49 }
0x1949   : > { %v2399_v53 = vpop.xlane.xlu0 %2398 }
0x194a   : > { %v2408_v43 = vadd.f32 %v2756_v34, %v2399_v53  ;;  %v2419_v56 = vsub.f32 0.0, %v2417_v20  ;;  %v2415_v19 = vsub.f32 %v2411_v21, %v2413_v23 }
0x194c   : > { %v2418_v15 = vand.u32 2147483647, %v2408_v43  ;;  %v2421_v54 = vmul.f32 1.442695, %v2419_v56  ;;  %2434 = vst.msk [vmem:[%s4276_s28 + $0x8] sm:$0xff] %vm2074_vm5, %v2408_v43  ;;  %v2412_v10 = vmax.f32 %v2408_v43, 0.0  ;;  %v2414_v47 = vmul.f32 %v2410_v31, %v2408_v43 }
0x194d   : > { %vm2443_vm5 = vcmask 15368  }
0x194e   : > { %v2420_v63 = vsub.f32 0.0, %v2418_v15  ;;  %3195 = vpow2.f32 %v2421_v54  ;;  %v2416_v27 = vsub.f32 %v2412_v10, %v2414_v47 }
0x1950   : > { %v2423_v57 = vmul.f32 1.442695, %v2420_v63 }
0x1952   : > { %3197 = vpow2.f32 %v2423_v57 }
0x1958   : > { %v3196_v14 = vpop.eup %3195 }
0x1959   : > { %v2425_v62 = vadd.f32 1.0, %v3196_v14 }
0x195b   : > { %3199 = vlog2.f32 %v2425_v62 }
0x195c   : > { %v3198_v42 = vpop.eup %3197 }
0x195d   : > { %v2426_v17 = vadd.f32 1.0, %v3198_v42 }
0x195f   : > { %3201 = vlog2.f32 %v2426_v17 }
0x1965   : > { %v3200_v36 = vpop.eup %3199 }
0x1966   : > { %v2428_v41 = vmul.f32 0.6931472, %v3200_v36 }
0x1968   : > { %v2431_v51 = vadd.f32 %v2428_v41, %v2415_v19 }
0x1969   : > { %v3202_v30 = vpop.eup %3201 }
0x196a   : > { %v2430_v7 = vmul.f32 0.6931472, %v3202_v30  ;;  %2437 = vrot.lane.b32.xlu0 %v2431_v51, %s3257_s30 }
0x196c   : > { %v2432_v32 = vadd.f32 %v2430_v7, %v2416_v27 }
0x196e   : > { %2439 = vrot.lane.b32.xlu1 %v2432_v32, %s3257_s30 }
0x19db   : > { %2461 = sbr.rel (!%p3370_p8) target bundleno = 6626 (0x19e2), region = 76 }
0x19dc   : > { %v2438_v45 = vpop.permute.xlu0 %2437 }
0x19dd   : > { %2444 = vst.msk [vmem:[%s4276_s28] sm:$0xff] %vm2443_vm5, %v2438_v45 }
0x19e0   : > { %v2440_v26 = vpop.permute.xlu1 %2439 }
0x19e1   : > { %2445 = vst.msk [vmem:[%s4276_s28 + $0x8] sm:$0xff] %vm2443_vm5, %v2440_v26 }
0x19e2 PF: > { %s4375_s26 = sld [smem:[#allocation13_spill]]  ;;  %s4376_s9 = sld [smem:[#allocation12_spill]] }
0x19e3   : > { %s4377_s25 = sld [smem:[#allocation14_spill]]  ;;  %s4378_s23 = smov %s3236_s24 }
0x19e8   : > { %p25_p0 = scmp.ge.s32.totalorder %s4375_s26, 4   ;;  %s4379_s24 = smov %s4376_s9 }
0x19ea   :  { %27 = sbr.rel (!%p25_p0) target bundleno = 6 (0x6), region = 179 }
0x19f1   :  { %2577 = vsyncpa [#allocation6], 1 }
0x19f2   :  { %2579 = vsyncpa [#allocation6 + $0x1], 1 }

</bundles_post_ra>
